<compile_context>
chip_gen: v6e
topology: v6e:2x2x1
jax: 0.10.0
libtpu: 0.0.40
codegen_flags: <defaults>
</compile_context>

<pallas_src>
import functools

import jax
import jax.numpy as jnp
import numpy as np
from jax.experimental import pallas as pl
from jax.experimental.pallas import tpu as pltpu


_COMPILER_PARAMS = pltpu.CompilerParams(dimension_semantics=("parallel",))


# ----------------------------- Pallas kernels ------------------------------ #

def _conv3x3_bn_leaky_kernel(x_ref, w_ref, b_ref, o_ref):
    """Fused 3x3 stride-1 'same' conv + folded-BN bias + LeakyReLU(0.1).

    x_ref: (1, H, W*Cin_tot) f32      one image, channels packed on the lane dim
    w_ref: (3, W*Cin_tot, W*Cout) bf16 per-row-tap banded weights (BN scale folded)
    b_ref: (1, W*Cout) f32            folded BN bias, tiled per output pixel
    o_ref: (1, H, W*Cout)
    """
    rows = x_ref[0]                                          # (H, WCin)
    zrow = jnp.zeros((1, rows.shape[1]), rows.dtype)
    above = jnp.concatenate([zrow, rows[:-1, :]], axis=0)    # row y-1 (zero @ top)
    below = jnp.concatenate([rows[1:, :], zrow], axis=0)     # row y+1 (zero @ bottom)
    acc = jnp.dot(above.astype(jnp.bfloat16), w_ref[0],
                  preferred_element_type=jnp.float32)
    acc = acc + jnp.dot(rows.astype(jnp.bfloat16), w_ref[1],
                        preferred_element_type=jnp.float32)
    acc = acc + jnp.dot(below.astype(jnp.bfloat16), w_ref[2],
                        preferred_element_type=jnp.float32)
    y = acc + b_ref[...]                                     # folded BN bias
    y = jnp.where(y >= 0.0, y, 0.1 * y)                      # LeakyReLU(0.1)
    o_ref[0] = y.astype(o_ref.dtype)


def _conv1x1_pair_bn_leaky_kernel(xa_ref, xb_ref, wa_ref, wb_ref, b_ref, o_ref):
    """1x1 conv over channel-concat([xa, xb]) done as two accumulating matmuls
    against the two halves of the weight (no concat materialized)."""
    acc = jnp.dot(xa_ref[0].astype(jnp.bfloat16), wa_ref[...],
                  preferred_element_type=jnp.float32)
    acc = acc + jnp.dot(xb_ref[0].astype(jnp.bfloat16), wb_ref[...],
                        preferred_element_type=jnp.float32)
    y = acc + b_ref[...]
    y = jnp.where(y >= 0.0, y, 0.1 * y)
    o_ref[0] = y.astype(o_ref.dtype)


def _maxpool_concat_kernel(r_ref, f_ref, o_ref, *, C):
    """2x2 / stride-2 max pool of concat([route, feat], channel), one image.

    r_ref/f_ref: (1, H, W//2, 2*C)   horizontal pixel pair folded into lanes
    o_ref:       (1, H//2, W//2, 2*C)
    """
    def pool(v):                                        # v: (H, Wh, 2C)
        hmax = jnp.maximum(v[..., :C], v[..., C:])      # max over the x-pair
        H = hmax.shape[0]
        hm = hmax.reshape(H // 2, 2, hmax.shape[1], C)  # leading-dim split only
        return jnp.max(hm, axis=1)                      # max over the y-pair

    o_ref[0, :, :, :C] = pool(r_ref[0])
    o_ref[0, :, :, C:] = pool(f_ref[0])


# ------------------------------ Pallas wrappers ----------------------------- #

def conv3x3_bn_leaky(x_packed, wband, bias_row):
    """x_packed: (N, H, W*Cin_tot) packed NHWC; wband: (3, W*Cin_tot, W*Cout)."""
    N, H, wcin = x_packed.shape
    k, K, wcout = wband.shape
    assert k == 3 and K == wcin
    return pl.pallas_call(
        _conv3x3_bn_leaky_kernel,
        out_shape=jax.ShapeDtypeStruct((N, H, wcout), x_packed.dtype),
        grid_spec=pltpu.PrefetchScalarGridSpec(
            num_scalar_prefetch=0,
            grid=(N,),
            in_specs=[pl.BlockSpec((1, H, wcin), lambda n: (n, 0, 0)),
                      pl.BlockSpec((3, K, wcout), lambda n: (0, 0, 0)),
                      pl.BlockSpec((1, wcout), lambda n: (0, 0))],
            out_specs=pl.BlockSpec((1, H, wcout), lambda n: (n, 0, 0)),
        ),
        compiler_params=_COMPILER_PARAMS,
    )(x_packed, wband, bias_row)


def conv1x1_pair_bn_leaky(xa, xb, wa, wb, bias_row):
    """1x1 BasicConv over concat([xa, xb], channel); xa/xb: (N, H, W*Ch) packed."""
    N, H, wc = xa.shape
    assert xb.shape == xa.shape
    K, wcout = wa.shape
    assert K == wc and wb.shape == wa.shape
    x_spec = pl.BlockSpec((1, H, wc), lambda n: (n, 0, 0))
    w_spec = pl.BlockSpec((K, wcout), lambda n: (0, 0))
    return pl.pallas_call(
        _conv1x1_pair_bn_leaky_kernel,
        out_shape=jax.ShapeDtypeStruct((N, H, wcout), xa.dtype),
        grid_spec=pltpu.PrefetchScalarGridSpec(
            num_scalar_prefetch=0,
            grid=(N,),
            in_specs=[x_spec, x_spec, w_spec, w_spec,
                      pl.BlockSpec((1, wcout), lambda n: (0, 0))],
            out_specs=pl.BlockSpec((1, H, wcout), lambda n: (n, 0, 0)),
        ),
        compiler_params=_COMPILER_PARAMS,
    )(xa, xb, wa, wb, bias_row)


def maxpool_concat_2x2(route4, feat4):
    """maxpool_2x2(concat([route, feat], channel)); inputs (N, H, W//2, 2*C)."""
    N, H, Wh, C2 = route4.shape
    assert feat4.shape == route4.shape and H % 2 == 0
    C = C2 // 2
    in_spec = pl.BlockSpec((1, H, Wh, C2), lambda n: (n, 0, 0, 0))
    return pl.pallas_call(
        functools.partial(_maxpool_concat_kernel, C=C),
        out_shape=jax.ShapeDtypeStruct((N, H // 2, Wh, C2), route4.dtype),
        grid_spec=pltpu.PrefetchScalarGridSpec(
            num_scalar_prefetch=0,
            grid=(N,),
            in_specs=[in_spec, in_spec],
            out_specs=pl.BlockSpec((1, H // 2, Wh, C2), lambda n: (n, 0, 0, 0)),
        ),
        compiler_params=_COMPILER_PARAMS,
    )(route4, feat4)


# ----------------------------- parameters / glue ---------------------------- #

def make_basicconv_params(key, cin, cout, k, eps=1e-5):
    """Deterministic synthetic BasicConv params (conv weight + BN, eval mode)."""
    w_oihw = jax.random.normal(key, (cout, cin, k, k), jnp.float32) * 0.1
    gamma = 1.0 + 0.10 * jnp.arange(cout, dtype=jnp.float32)
    beta = -0.10 + 0.05 * jnp.arange(cout, dtype=jnp.float32)
    mean = 0.02 * jnp.arange(cout, dtype=jnp.float32)
    var = 1.0 + 0.03 * jnp.arange(cout, dtype=jnp.float32)
    scale = gamma / jnp.sqrt(var + eps)          # BN folded: y = scale*conv + bias
    bias = beta - mean * scale
    return dict(w_oihw=w_oihw, scale=scale, bias=bias, k=k)


def _band_conv_weight(w_oihw, scale, *, W, cin_total, cin_start):
    """Lower a kxk stride-1 'same' conv (BN scale folded) to k banded matrices.

    Row layout : x_in * cin_total + cin_start + ci   (packed-NHWC input lanes)
    Col layout : x_out * cout + co                   (packed-NHWC output lanes)
    Returns (k, W*cin_total, W*cout) float32; band[dy] multiplies input row
    y + dy - k//2.  Horizontal 'same' padding is folded in (out-of-range taps
    simply have no entries).  The channel split (cin_start) is folded in too.
    """
    w = (np.asarray(w_oihw, np.float32)
         * np.asarray(scale, np.float32).reshape(-1, 1, 1, 1))
    cout, cin, k, _ = w.shape
    pad = k // 2
    band = np.zeros((k, W * cin_total, W * cout), np.float32)
    for dy in range(k):
        for dx in range(k):
            tap = w[:, :, dy, dx].T                       # (cin, cout)
            for xo in range(W):
                xi = xo + dx - pad
                if 0 <= xi < W:
                    r0 = xi * cin_total + cin_start
                    band[dy, r0:r0 + cin, xo * cout:(xo + 1) * cout] = tap
    return band


def lower_resblock_params(params, *, in_channels, out_channels, W):
    """Precompute banded bf16 weights + packed bias rows for the Pallas kernels."""
    c = out_channels

    def band(p, cin_total, cin_start, w_oihw=None):
        w = p['w_oihw'] if w_oihw is None else w_oihw
        wb = _band_conv_weight(w, p['scale'], W=W,
                               cin_total=cin_total, cin_start=cin_start)
        brow = np.tile(np.asarray(p['bias'], np.float32), W).reshape(1, -1)
        return jnp.asarray(wb, jnp.bfloat16), jnp.asarray(brow, jnp.float32)

    w1, b1 = band(params['conv1'], in_channels, 0)
    # torch.split(route, c//2, dim=1)[1] folded into conv2's band (upper half rows)
    w2, b2 = band(params['conv2'], c, c // 2)
    w3, b3 = band(params['conv3'], c // 2, 0)
    p4 = params['conv4']
    w4 = np.asarray(p4['w_oihw'], np.float32)              # (c, c, 1, 1)
    w4a, b4 = band(p4, c // 2, 0, w_oihw=w4[:, :c // 2])   # concat half: conv3 out
    w4b, _ = band(p4, c // 2, 0, w_oihw=w4[:, c // 2:])    # concat half: route1
    return dict(w1=w1, b1=b1, w2=w2, b2=b2, w3=w3, b3=b3,
                w4a=w4a[0], w4b=w4b[0], b4=b4)


def resblock_body_forward(x_nchw, lowered, *, out_channels):
    """Pallas implementation of Resblock_body.forward; returns (pooled, feat) NCHW."""
    N, cin, H, W = x_nchw.shape
    c = out_channels
    # TODO(synk): MaxPool2d(2,2) truncates odd H/W; only even sizes handled here.
    assert H % 2 == 0 and W % 2 == 0
    x = jnp.transpose(x_nchw, (0, 2, 3, 1)).reshape(N, H, W * cin)   # packed NHWC

    route = conv3x3_bn_leaky(x, lowered['w1'], lowered['b1'])        # (N,H,W*c)
    route1 = conv3x3_bn_leaky(route, lowered['w2'], lowered['b2'])   # (N,H,W*c/2)
    x3 = conv3x3_bn_leaky(route1, lowered['w3'], lowered['b3'])      # (N,H,W*c/2)
    feat_p = conv1x1_pair_bn_leaky(x3, route1, lowered['w4a'],
                                   lowered['w4b'], lowered['b4'])    # (N,H,W*c)
    # maxpool(cat([route, feat], channel)) without materializing the concat;
    # the reshapes just fold the horizontal pixel pair into the lane dim (free).
    pooled = maxpool_concat_2x2(route.reshape(N, H, W // 2, 2 * c),
                                feat_p.reshape(N, H, W // 2, 2 * c)) # (N,H/2,W/2,2c)

    feat = feat_p.reshape(N, H, W, c)
    return (jnp.transpose(pooled, (0, 3, 1, 2)),     # NHWC -> NCHW
            jnp.transpose(feat, (0, 3, 1, 2)))


# ------------------------------- pure-JAX ref ------------------------------- #

def _conv_bn_leaky_ref(x, p):
    pad = p['k'] // 2
    y = jax.lax.conv_general_dilated(
        x, p['w_oihw'], window_strides=(1, 1),
        padding=[(pad, pad), (pad, pad)],
        dimension_numbers=('NCHW', 'OIHW', 'NCHW'))
    y = y * p['scale'].reshape(1, -1, 1, 1) + p['bias'].reshape(1, -1, 1, 1)
    return jnp.where(y >= 0, y, 0.1 * y)


def resblock_body_ref(x, params, out_channels):
    x = _conv_bn_leaky_ref(x, params['conv1'])
    route = x
    c = out_channels
    x = x[:, c // 2:, :, :]
    x = _conv_bn_leaky_ref(x, params['conv2'])
    route1 = x
    x = _conv_bn_leaky_ref(x, params['conv3'])
    x = jnp.concatenate([x, route1], axis=1)
    x = _conv_bn_leaky_ref(x, params['conv4'])
    feat = x
    x = jnp.concatenate([route, x], axis=1)
    N, C, H, W = x.shape
    x = x.reshape(N, C, H // 2, 2, W // 2, 2).max(axis=(3, 5))
    return x, feat


# ----------------------------------- main ----------------------------------- #

if __name__ == "__main__":
    key = jax.random.PRNGKey(0)
    k_in, k1, k2, k3, k4 = jax.random.split(key, 5)

    in_channels, out_channels = 4, 8
    N, H, W = 2, 16, 16
    x = jax.random.normal(k_in, (N, in_channels, H, W), jnp.float32)

    params = {
        'conv1': make_basicconv_params(k1, in_channels, out_channels, 3),
        'conv2': make_basicconv_params(k2, out_channels // 2, out_channels // 2, 3),
        'conv3': make_basicconv_params(k3, out_channels // 2, out_channels // 2, 3),
        'conv4': make_basicconv_params(k4, out_channels, out_channels, 1),
    }
    lowered = lower_resblock_params(params, in_channels=in_channels,
                                    out_channels=out_channels, W=W)

    fwd = jax.jit(functools.partial(resblock_body_forward,
                                    out_channels=out_channels))
    pooled, feat = fwd(x, lowered)
    jax.block_until_ready((pooled, feat))

    assert pooled.shape == (N, 2 * out_channels, H // 2, W // 2), pooled.shape
    assert feat.shape == (N, out_channels, H, W), feat.shape

    pooled_ref, feat_ref = resblock_body_ref(x, params, out_channels)
    np.testing.assert_allclose(np.asarray(feat), np.asarray(feat_ref),
                               rtol=3e-2, atol=3e-2)
    np.testing.assert_allclose(np.asarray(pooled), np.asarray(pooled_ref),
                               rtol=3e-2, atol=3e-2)

    print("KERNEL_OK")
</pallas_src>

<mosaic_0001>
module attributes {stable_mosaic.version = 11 : i64} {
  func.func @_conv3x3_bn_leaky_kernel(%arg0: i32, %arg1: memref<1x16x64xf32, #tpu.memory_space<vmem>>, %arg2: memref<3x64x128xbf16, #tpu.memory_space<vmem>>, %arg3: memref<1x128xf32, #tpu.memory_space<vmem>>, %arg4: memref<1x16x128xf32, #tpu.memory_space<vmem>>) attributes {dimension_semantics = [#tpu.dimension_semantics<parallel>], iteration_bounds = array<i64: 2>, scalar_prefetch = 0 : i64, scratch_operands = 0 : i64, tpu.core_type = #tpu.core_type<tc>, window_params = [{transform_indices = @transform_0, window_bounds = array<i64: 1, 16, 64>}, {pipeline_mode = #tpu.pipeline_mode<synchronous>, transform_indices = @transform_1, window_bounds = array<i64: 3, 64, 128>}, {pipeline_mode = #tpu.pipeline_mode<synchronous>, transform_indices = @transform_2, window_bounds = array<i64: 1, 128>}, {transform_indices = @transform_3, window_bounds = array<i64: 1, 16, 128>}]} {
    %c0 = arith.constant 0 : index
    %c0_0 = arith.constant 0 : index
    %c0_1 = arith.constant 0 : index
    %0 = vector.load %arg1[%c0, %c0_0, %c0_1] : memref<1x16x64xf32, #tpu.memory_space<vmem>>, vector<1x16x64xf32>
    %1 = vector.shape_cast %0 : vector<1x16x64xf32> to vector<16x64xf32>
    %cst = arith.constant 0.000000e+00 : f32
    %2 = vector.broadcast %cst : f32 to vector<1x64xf32>
    %3 = vector.extract_strided_slice %1 {offsets = [0, 0], sizes = [15, 64], strides = [1, 1]} : vector<16x64xf32> to vector<15x64xf32>
    %4 = tpu.concatenate %2, %3 in 0 : vector<1x64xf32>, vector<15x64xf32> -> vector<16x64xf32>
    %5 = vector.extract_strided_slice %1 {offsets = [1, 0], sizes = [15, 64], strides = [1, 1]} : vector<16x64xf32> to vector<15x64xf32>
    %6 = tpu.concatenate %5, %2 in 0 : vector<15x64xf32>, vector<1x64xf32> -> vector<16x64xf32>
    %7 = arith.truncf %4 : vector<16x64xf32> to vector<16x64xbf16>
    %c0_2 = arith.constant 0 : index
    %c0_3 = arith.constant 0 : index
    %c0_4 = arith.constant 0 : index
    %8 = vector.load %arg2[%c0_2, %c0_3, %c0_4] : memref<3x64x128xbf16, #tpu.memory_space<vmem>>, vector<1x64x128xbf16>
    %9 = vector.shape_cast %8 : vector<1x64x128xbf16> to vector<64x128xbf16>
    %cst_5 = arith.constant dense<0.000000e+00> : vector<16x128xf32>
    %10 = tpu.matmul %7, %9, %cst_5 {dimension_numbers = #tpu.dot_dimension_numbers<[1], [0], [0], [1], [0, 0, 1, 1], [], []>} : vector<16x64xbf16>, vector<64x128xbf16>, vector<16x128xf32> -> vector<16x128xf32>
    %11 = arith.truncf %1 : vector<16x64xf32> to vector<16x64xbf16>
    %c1 = arith.constant 1 : index
    %c0_6 = arith.constant 0 : index
    %c0_7 = arith.constant 0 : index
    %12 = vector.load %arg2[%c1, %c0_6, %c0_7] : memref<3x64x128xbf16, #tpu.memory_space<vmem>>, vector<1x64x128xbf16>
    %13 = vector.shape_cast %12 : vector<1x64x128xbf16> to vector<64x128xbf16>
    %cst_8 = arith.constant dense<0.000000e+00> : vector<16x128xf32>
    %14 = tpu.matmul %11, %13, %cst_8 {dimension_numbers = #tpu.dot_dimension_numbers<[1], [0], [0], [1], [0, 0, 1, 1], [], []>} : vector<16x64xbf16>, vector<64x128xbf16>, vector<16x128xf32> -> vector<16x128xf32>
    %15 = arith.addf %10, %14 : vector<16x128xf32>
    %16 = arith.truncf %6 : vector<16x64xf32> to vector<16x64xbf16>
    %c2 = arith.constant 2 : index
    %c0_9 = arith.constant 0 : index
    %c0_10 = arith.constant 0 : index
    %17 = vector.load %arg2[%c2, %c0_9, %c0_10] : memref<3x64x128xbf16, #tpu.memory_space<vmem>>, vector<1x64x128xbf16>
    %18 = vector.shape_cast %17 : vector<1x64x128xbf16> to vector<64x128xbf16>
    %cst_11 = arith.constant dense<0.000000e+00> : vector<16x128xf32>
    %19 = tpu.matmul %16, %18, %cst_11 {dimension_numbers = #tpu.dot_dimension_numbers<[1], [0], [0], [1], [0, 0, 1, 1], [], []>} : vector<16x64xbf16>, vector<64x128xbf16>, vector<16x128xf32> -> vector<16x128xf32>
    %20 = arith.addf %15, %19 : vector<16x128xf32>
    %c0_12 = arith.constant 0 : index
    %c0_13 = arith.constant 0 : index
    %21 = vector.load %arg3[%c0_12, %c0_13] : memref<1x128xf32, #tpu.memory_space<vmem>>, vector<1x128xf32>
    %22 = vector.broadcast %21 : vector<1x128xf32> to vector<16x128xf32>
    %23 = arith.addf %20, %22 : vector<16x128xf32>
    %cst_14 = arith.constant 0.000000e+00 : f32
    %24 = vector.broadcast %cst_14 : f32 to vector<16x128xf32>
    %25 = arith.cmpf oge, %23, %24 : vector<16x128xf32>
    %cst_15 = arith.constant 1.000000e-01 : f32
    %26 = vector.broadcast %cst_15 : f32 to vector<16x128xf32>
    %27 = arith.mulf %26, %23 : vector<16x128xf32>
    %28 = arith.select %25, %23, %27 : vector<16x128xi1>, vector<16x128xf32>
    %c0_16 = arith.constant 0 : index
    %c0_17 = arith.constant 0 : index
    %c0_18 = arith.constant 0 : index
    %29 = vector.load %arg4[%c0_16, %c0_17, %c0_18] : memref<1x16x128xf32, #tpu.memory_space<vmem>>, vector<1x16x128xf32>
    %30 = vector.shape_cast %29 : vector<1x16x128xf32> to vector<16x128xf32>
    %31 = vector.shape_cast %28 : vector<16x128xf32> to vector<1x16x128xf32>
    tpu.vector_store %arg4[%c0_16, %c0_17, %c0_18], %31 {strides = array<i32>} : memref<1x16x128xf32, #tpu.memory_space<vmem>>, vector<1x16x128xf32>,
    return
  }
  func.func @transform_0(%arg0: i32) -> (i32, i32, i32) {
    %c0_i32 = arith.constant 0 : i32
    %c0_i32_0 = arith.constant 0 : i32
    %c0_i32_1 = arith.constant 0 : i32
    return %arg0, %c0_i32, %c0_i32_0 : i32, i32, i32
  }
  func.func @transform_1(%arg0: i32) -> (i32, i32, i32) {
    %c0_i32 = arith.constant 0 : i32
    %c0_i32_0 = arith.constant 0 : i32
    %c0_i32_1 = arith.constant 0 : i32
    %c0_i32_2 = arith.constant 0 : i32
    return %c0_i32, %c0_i32_0, %c0_i32_1 : i32, i32, i32
  }
  func.func @transform_2(%arg0: i32) -> (i32, i32) {
    %c0_i32 = arith.constant 0 : i32
    %c0_i32_0 = arith.constant 0 : i32
    %c0_i32_1 = arith.constant 0 : i32
    return %c0_i32, %c0_i32_0 : i32, i32
  }
  func.func @transform_3(%arg0: i32) -> (i32, i32, i32) {
    %c0_i32 = arith.constant 0 : i32
    %c0_i32_0 = arith.constant 0 : i32
    %c0_i32_1 = arith.constant 0 : i32
    return %arg0, %c0_i32, %c0_i32_0 : i32, i32, i32
  }
}

module attributes {stable_mosaic.version = 11 : i64} {
  func.func @_conv1x1_pair_bn_leaky_kernel(%arg0: i32, %arg1: memref<1x16x64xf32, #tpu.memory_space<vmem>>, %arg2: memref<1x16x64xf32, #tpu.memory_space<vmem>>, %arg3: memref<64x128xbf16, #tpu.memory_space<vmem>>, %arg4: memref<64x128xbf16, #tpu.memory_space<vmem>>, %arg5: memref<1x128xf32, #tpu.memory_space<vmem>>, %arg6: memref<1x16x128xf32, #tpu.memory_space<vmem>>) attributes {dimension_semantics = [#tpu.dimension_semantics<parallel>], iteration_bounds = array<i64: 2>, scalar_prefetch = 0 : i64, scratch_operands = 0 : i64, tpu.core_type = #tpu.core_type<tc>, window_params = [{transform_indices = @transform_0, window_bounds = array<i64: 1, 16, 64>}, {transform_indices = @transform_1, window_bounds = array<i64: 1, 16, 64>}, {pipeline_mode = #tpu.pipeline_mode<synchronous>, transform_indices = @transform_2, window_bounds = array<i64: 64, 128>}, {pipeline_mode = #tpu.pipeline_mode<synchronous>, transform_indices = @transform_3, window_bounds = array<i64: 64, 128>}, {pipeline_mode = #tpu.pipeline_mode<synchronous>, transform_indices = @transform_4, window_bounds = array<i64: 1, 128>}, {transform_indices = @transform_5, window_bounds = array<i64: 1, 16, 128>}]} {
    %c0 = arith.constant 0 : index
    %c0_0 = arith.constant 0 : index
    %c0_1 = arith.constant 0 : index
    %0 = vector.load %arg1[%c0, %c0_0, %c0_1] : memref<1x16x64xf32, #tpu.memory_space<vmem>>, vector<1x16x64xf32>
    %1 = vector.shape_cast %0 : vector<1x16x64xf32> to vector<16x64xf32>
    %2 = arith.truncf %1 : vector<16x64xf32> to vector<16x64xbf16>
    %c0_2 = arith.constant 0 : index
    %c0_3 = arith.constant 0 : index
    %3 = vector.load %arg3[%c0_2, %c0_3] : memref<64x128xbf16, #tpu.memory_space<vmem>>, vector<64x128xbf16>
    %cst = arith.constant dense<0.000000e+00> : vector<16x128xf32>
    %4 = tpu.matmul %2, %3, %cst {dimension_numbers = #tpu.dot_dimension_numbers<[1], [0], [0], [1], [0, 0, 1, 1], [], []>} : vector<16x64xbf16>, vector<64x128xbf16>, vector<16x128xf32> -> vector<16x128xf32>
    %c0_4 = arith.constant 0 : index
    %c0_5 = arith.constant 0 : index
    %c0_6 = arith.constant 0 : index
    %5 = vector.load %arg2[%c0_4, %c0_5, %c0_6] : memref<1x16x64xf32, #tpu.memory_space<vmem>>, vector<1x16x64xf32>
    %6 = vector.shape_cast %5 : vector<1x16x64xf32> to vector<16x64xf32>
    %7 = arith.truncf %6 : vector<16x64xf32> to vector<16x64xbf16>
    %c0_7 = arith.constant 0 : index
    %c0_8 = arith.constant 0 : index
    %8 = vector.load %arg4[%c0_7, %c0_8] : memref<64x128xbf16, #tpu.memory_space<vmem>>, vector<64x128xbf16>
    %cst_9 = arith.constant dense<0.000000e+00> : vector<16x128xf32>
    %9 = tpu.matmul %7, %8, %cst_9 {dimension_numbers = #tpu.dot_dimension_numbers<[1], [0], [0], [1], [0, 0, 1, 1], [], []>} : vector<16x64xbf16>, vector<64x128xbf16>, vector<16x128xf32> -> vector<16x128xf32>
    %10 = arith.addf %4, %9 : vector<16x128xf32>
    %c0_10 = arith.constant 0 : index
    %c0_11 = arith.constant 0 : index
    %11 = vector.load %arg5[%c0_10, %c0_11] : memref<1x128xf32, #tpu.memory_space<vmem>>, vector<1x128xf32>
    %12 = vector.broadcast %11 : vector<1x128xf32> to vector<16x128xf32>
    %13 = arith.addf %10, %12 : vector<16x128xf32>
    %cst_12 = arith.constant 0.000000e+00 : f32
    %14 = vector.broadcast %cst_12 : f32 to vector<16x128xf32>
    %15 = arith.cmpf oge, %13, %14 : vector<16x128xf32>
    %cst_13 = arith.constant 1.000000e-01 : f32
    %16 = vector.broadcast %cst_13 : f32 to vector<16x128xf32>
    %17 = arith.mulf %16, %13 : vector<16x128xf32>
    %18 = arith.select %15, %13, %17 : vector<16x128xi1>, vector<16x128xf32>
    %c0_14 = arith.constant 0 : index
    %c0_15 = arith.constant 0 : index
    %c0_16 = arith.constant 0 : index
    %19 = vector.load %arg6[%c0_14, %c0_15, %c0_16] : memref<1x16x128xf32, #tpu.memory_space<vmem>>, vector<1x16x128xf32>
    %20 = vector.shape_cast %19 : vector<1x16x128xf32> to vector<16x128xf32>
    %21 = vector.shape_cast %18 : vector<16x128xf32> to vector<1x16x128xf32>
    tpu.vector_store %arg6[%c0_14, %c0_15, %c0_16], %21 {strides = array<i32>} : memref<1x16x128xf32, #tpu.memory_space<vmem>>, vector<1x16x128xf32>,
    return
  }
  func.func @transform_0(%arg0: i32) -> (i32, i32, i32) {
    %c0_i32 = arith.constant 0 : i32
    %c0_i32_0 = arith.constant 0 : i32
    %c0_i32_1 = arith.constant 0 : i32
    return %arg0, %c0_i32, %c0_i32_0 : i32, i32, i32
  }
  func.func @transform_1(%arg0: i32) -> (i32, i32, i32) {
    %c0_i32 = arith.constant 0 : i32
    %c0_i32_0 = arith.constant 0 : i32
    %c0_i32_1 = arith.constant 0 : i32
    return %arg0, %c0_i32, %c0_i32_0 : i32, i32, i32
  }
  func.func @transform_2(%arg0: i32) -> (i32, i32) {
    %c0_i32 = arith.constant 0 : i32
    %c0_i32_0 = arith.constant 0 : i32
    %c0_i32_1 = arith.constant 0 : i32
    return %c0_i32, %c0_i32_0 : i32, i32
  }
  func.func @transform_3(%arg0: i32) -> (i32, i32) {
    %c0_i32 = arith.constant 0 : i32
    %c0_i32_0 = arith.constant 0 : i32
    %c0_i32_1 = arith.constant 0 : i32
    return %c0_i32, %c0_i32_0 : i32, i32
  }
  func.func @transform_4(%arg0: i32) -> (i32, i32) {
    %c0_i32 = arith.constant 0 : i32
    %c0_i32_0 = arith.constant 0 : i32
    %c0_i32_1 = arith.constant 0 : i32
    return %c0_i32, %c0_i32_0 : i32, i32
  }
  func.func @transform_5(%arg0: i32) -> (i32, i32, i32) {
    %c0_i32 = arith.constant 0 : i32
    %c0_i32_0 = arith.constant 0 : i32
    %c0_i32_1 = arith.constant 0 : i32
    return %arg0, %c0_i32, %c0_i32_0 : i32, i32, i32
  }
}

module attributes {stable_mosaic.version = 11 : i64} {
  func.func @_conv3x3_bn_leaky_kernel(%arg0: i32, %arg1: memref<1x16x64xf32, #tpu.memory_space<vmem>>, %arg2: memref<3x64x64xbf16, #tpu.memory_space<vmem>>, %arg3: memref<1x64xf32, #tpu.memory_space<vmem>>, %arg4: memref<1x16x64xf32, #tpu.memory_space<vmem>>) attributes {dimension_semantics = [#tpu.dimension_semantics<parallel>], iteration_bounds = array<i64: 2>, scalar_prefetch = 0 : i64, scratch_operands = 0 : i64, tpu.core_type = #tpu.core_type<tc>, window_params = [{transform_indices = @transform_0, window_bounds = array<i64: 1, 16, 64>}, {pipeline_mode = #tpu.pipeline_mode<synchronous>, transform_indices = @transform_1, window_bounds = array<i64: 3, 64, 64>}, {pipeline_mode = #tpu.pipeline_mode<synchronous>, transform_indices = @transform_2, window_bounds = array<i64: 1, 64>}, {transform_indices = @transform_3, window_bounds = array<i64: 1, 16, 64>}]} {
    %c0 = arith.constant 0 : index
    %c0_0 = arith.constant 0 : index
    %c0_1 = arith.constant 0 : index
    %0 = vector.load %arg1[%c0, %c0_0, %c0_1] : memref<1x16x64xf32, #tpu.memory_space<vmem>>, vector<1x16x64xf32>
    %1 = vector.shape_cast %0 : vector<1x16x64xf32> to vector<16x64xf32>
    %cst = arith.constant 0.000000e+00 : f32
    %2 = vector.broadcast %cst : f32 to vector<1x64xf32>
    %3 = vector.extract_strided_slice %1 {offsets = [0, 0], sizes = [15, 64], strides = [1, 1]} : vector<16x64xf32> to vector<15x64xf32>
    %4 = tpu.concatenate %2, %3 in 0 : vector<1x64xf32>, vector<15x64xf32> -> vector<16x64xf32>
    %5 = vector.extract_strided_slice %1 {offsets = [1, 0], sizes = [15, 64], strides = [1, 1]} : vector<16x64xf32> to vector<15x64xf32>
    %6 = tpu.concatenate %5, %2 in 0 : vector<15x64xf32>, vector<1x64xf32> -> vector<16x64xf32>
    %7 = arith.truncf %4 : vector<16x64xf32> to vector<16x64xbf16>
    %c0_2 = arith.constant 0 : index
    %c0_3 = arith.constant 0 : index
    %c0_4 = arith.constant 0 : index
    %8 = vector.load %arg2[%c0_2, %c0_3, %c0_4] : memref<3x64x64xbf16, #tpu.memory_space<vmem>>, vector<1x64x64xbf16>
    %9 = vector.shape_cast %8 : vector<1x64x64xbf16> to vector<64x64xbf16>
    %cst_5 = arith.constant dense<0.000000e+00> : vector<16x64xf32>
    %10 = tpu.matmul %7, %9, %cst_5 {dimension_numbers = #tpu.dot_dimension_numbers<[1], [0], [0], [1], [0, 0, 1, 1], [], []>} : vector<16x64xbf16>, vector<64x64xbf16>, vector<16x64xf32> -> vector<16x64xf32>
    %11 = arith.truncf %1 : vector<16x64xf32> to vector<16x64xbf16>
    %c1 = arith.constant 1 : index
    %c0_6 = arith.constant 0 : index
    %c0_7 = arith.constant 0 : index
    %12 = vector.load %arg2[%c1, %c0_6, %c0_7] : memref<3x64x64xbf16, #tpu.memory_space<vmem>>, vector<1x64x64xbf16>
    %13 = vector.shape_cast %12 : vector<1x64x64xbf16> to vector<64x64xbf16>
    %cst_8 = arith.constant dense<0.000000e+00> : vector<16x64xf32>
    %14 = tpu.matmul %11, %13, %cst_8 {dimension_numbers = #tpu.dot_dimension_numbers<[1], [0], [0], [1], [0, 0, 1, 1], [], []>} : vector<16x64xbf16>, vector<64x64xbf16>, vector<16x64xf32> -> vector<16x64xf32>
    %15 = arith.addf %10, %14 : vector<16x64xf32>
    %16 = arith.truncf %6 : vector<16x64xf32> to vector<16x64xbf16>
    %c2 = arith.constant 2 : index
    %c0_9 = arith.constant 0 : index
    %c0_10 = arith.constant 0 : index
    %17 = vector.load %arg2[%c2, %c0_9, %c0_10] : memref<3x64x64xbf16, #tpu.memory_space<vmem>>, vector<1x64x64xbf16>
    %18 = vector.shape_cast %17 : vector<1x64x64xbf16> to vector<64x64xbf16>
    %cst_11 = arith.constant dense<0.000000e+00> : vector<16x64xf32>
    %19 = tpu.matmul %16, %18, %cst_11 {dimension_numbers = #tpu.dot_dimension_numbers<[1], [0], [0], [1], [0, 0, 1, 1], [], []>} : vector<16x64xbf16>, vector<64x64xbf16>, vector<16x64xf32> -> vector<16x64xf32>
    %20 = arith.addf %15, %19 : vector<16x64xf32>
    %c0_12 = arith.constant 0 : index
    %c0_13 = arith.constant 0 : index
    %21 = vector.load %arg3[%c0_12, %c0_13] : memref<1x64xf32, #tpu.memory_space<vmem>>, vector<1x64xf32>
    %22 = vector.broadcast %21 : vector<1x64xf32> to vector<16x64xf32>
    %23 = arith.addf %20, %22 : vector<16x64xf32>
    %cst_14 = arith.constant 0.000000e+00 : f32
    %24 = vector.broadcast %cst_14 : f32 to vector<16x64xf32>
    %25 = arith.cmpf oge, %23, %24 : vector<16x64xf32>
    %cst_15 = arith.constant 1.000000e-01 : f32
    %26 = vector.broadcast %cst_15 : f32 to vector<16x64xf32>
    %27 = arith.mulf %26, %23 : vector<16x64xf32>
    %28 = arith.select %25, %23, %27 : vector<16x64xi1>, vector<16x64xf32>
    %c0_16 = arith.constant 0 : index
    %c0_17 = arith.constant 0 : index
    %c0_18 = arith.constant 0 : index
    %29 = vector.load %arg4[%c0_16, %c0_17, %c0_18] : memref<1x16x64xf32, #tpu.memory_space<vmem>>, vector<1x16x64xf32>
    %30 = vector.shape_cast %29 : vector<1x16x64xf32> to vector<16x64xf32>
    %31 = vector.shape_cast %28 : vector<16x64xf32> to vector<1x16x64xf32>
    tpu.vector_store %arg4[%c0_16, %c0_17, %c0_18], %31 {strides = array<i32>} : memref<1x16x64xf32, #tpu.memory_space<vmem>>, vector<1x16x64xf32>,
    return
  }
  func.func @transform_0(%arg0: i32) -> (i32, i32, i32) {
    %c0_i32 = arith.constant 0 : i32
    %c0_i32_0 = arith.constant 0 : i32
    %c0_i32_1 = arith.constant 0 : i32
    return %arg0, %c0_i32, %c0_i32_0 : i32, i32, i32
  }
  func.func @transform_1(%arg0: i32) -> (i32, i32, i32) {
    %c0_i32 = arith.constant 0 : i32
    %c0_i32_0 = arith.constant 0 : i32
    %c0_i32_1 = arith.constant 0 : i32
    %c0_i32_2 = arith.constant 0 : i32
    return %c0_i32, %c0_i32_0, %c0_i32_1 : i32, i32, i32
  }
  func.func @transform_2(%arg0: i32) -> (i32, i32) {
    %c0_i32 = arith.constant 0 : i32
    %c0_i32_0 = arith.constant 0 : i32
    %c0_i32_1 = arith.constant 0 : i32
    return %c0_i32, %c0_i32_0 : i32, i32
  }
  func.func @transform_3(%arg0: i32) -> (i32, i32, i32) {
    %c0_i32 = arith.constant 0 : i32
    %c0_i32_0 = arith.constant 0 : i32
    %c0_i32_1 = arith.constant 0 : i32
    return %arg0, %c0_i32, %c0_i32_0 : i32, i32, i32
  }
}

module attributes {stable_mosaic.version = 11 : i64} {
  func.func @_conv3x3_bn_leaky_kernel(%arg0: i32, %arg1: memref<1x16x128xf32, #tpu.memory_space<vmem>>, %arg2: memref<3x128x64xbf16, #tpu.memory_space<vmem>>, %arg3: memref<1x64xf32, #tpu.memory_space<vmem>>, %arg4: memref<1x16x64xf32, #tpu.memory_space<vmem>>) attributes {dimension_semantics = [#tpu.dimension_semantics<parallel>], iteration_bounds = array<i64: 2>, scalar_prefetch = 0 : i64, scratch_operands = 0 : i64, tpu.core_type = #tpu.core_type<tc>, window_params = [{transform_indices = @transform_0, window_bounds = array<i64: 1, 16, 128>}, {pipeline_mode = #tpu.pipeline_mode<synchronous>, transform_indices = @transform_1, window_bounds = array<i64: 3, 128, 64>}, {pipeline_mode = #tpu.pipeline_mode<synchronous>, transform_indices = @transform_2, window_bounds = array<i64: 1, 64>}, {transform_indices = @transform_3, window_bounds = array<i64: 1, 16, 64>}]} {
    %c0 = arith.constant 0 : index
    %c0_0 = arith.constant 0 : index
    %c0_1 = arith.constant 0 : index
    %0 = vector.load %arg1[%c0, %c0_0, %c0_1] : memref<1x16x128xf32, #tpu.memory_space<vmem>>, vector<1x16x128xf32>
    %1 = vector.shape_cast %0 : vector<1x16x128xf32> to vector<16x128xf32>
    %cst = arith.constant 0.000000e+00 : f32
    %2 = vector.broadcast %cst : f32 to vector<1x128xf32>
    %3 = vector.extract_strided_slice %1 {offsets = [0, 0], sizes = [15, 128], strides = [1, 1]} : vector<16x128xf32> to vector<15x128xf32>
    %4 = tpu.concatenate %2, %3 in 0 : vector<1x128xf32>, vector<15x128xf32> -> vector<16x128xf32>
    %5 = vector.extract_strided_slice %1 {offsets = [1, 0], sizes = [15, 128], strides = [1, 1]} : vector<16x128xf32> to vector<15x128xf32>
    %6 = tpu.concatenate %5, %2 in 0 : vector<15x128xf32>, vector<1x128xf32> -> vector<16x128xf32>
    %7 = arith.truncf %4 : vector<16x128xf32> to vector<16x128xbf16>
    %c0_2 = arith.constant 0 : index
    %c0_3 = arith.constant 0 : index
    %c0_4 = arith.constant 0 : index
    %8 = vector.load %arg2[%c0_2, %c0_3, %c0_4] : memref<3x128x64xbf16, #tpu.memory_space<vmem>>, vector<1x128x64xbf16>
    %9 = vector.shape_cast %8 : vector<1x128x64xbf16> to vector<128x64xbf16>
    %cst_5 = arith.constant dense<0.000000e+00> : vector<16x64xf32>
    %10 = tpu.matmul %7, %9, %cst_5 {dimension_numbers = #tpu.dot_dimension_numbers<[1], [0], [0], [1], [0, 0, 1, 1], [], []>} : vector<16x128xbf16>, vector<128x64xbf16>, vector<16x64xf32> -> vector<16x64xf32>
    %11 = arith.truncf %1 : vector<16x128xf32> to vector<16x128xbf16>
    %c1 = arith.constant 1 : index
    %c0_6 = arith.constant 0 : index
    %c0_7 = arith.constant 0 : index
    %12 = vector.load %arg2[%c1, %c0_6, %c0_7] : memref<3x128x64xbf16, #tpu.memory_space<vmem>>, vector<1x128x64xbf16>
    %13 = vector.shape_cast %12 : vector<1x128x64xbf16> to vector<128x64xbf16>
    %cst_8 = arith.constant dense<0.000000e+00> : vector<16x64xf32>
    %14 = tpu.matmul %11, %13, %cst_8 {dimension_numbers = #tpu.dot_dimension_numbers<[1], [0], [0], [1], [0, 0, 1, 1], [], []>} : vector<16x128xbf16>, vector<128x64xbf16>, vector<16x64xf32> -> vector<16x64xf32>
    %15 = arith.addf %10, %14 : vector<16x64xf32>
    %16 = arith.truncf %6 : vector<16x128xf32> to vector<16x128xbf16>
    %c2 = arith.constant 2 : index
    %c0_9 = arith.constant 0 : index
    %c0_10 = arith.constant 0 : index
    %17 = vector.load %arg2[%c2, %c0_9, %c0_10] : memref<3x128x64xbf16, #tpu.memory_space<vmem>>, vector<1x128x64xbf16>
    %18 = vector.shape_cast %17 : vector<1x128x64xbf16> to vector<128x64xbf16>
    %cst_11 = arith.constant dense<0.000000e+00> : vector<16x64xf32>
    %19 = tpu.matmul %16, %18, %cst_11 {dimension_numbers = #tpu.dot_dimension_numbers<[1], [0], [0], [1], [0, 0, 1, 1], [], []>} : vector<16x128xbf16>, vector<128x64xbf16>, vector<16x64xf32> -> vector<16x64xf32>
    %20 = arith.addf %15, %19 : vector<16x64xf32>
    %c0_12 = arith.constant 0 : index
    %c0_13 = arith.constant 0 : index
    %21 = vector.load %arg3[%c0_12, %c0_13] : memref<1x64xf32, #tpu.memory_space<vmem>>, vector<1x64xf32>
    %22 = vector.broadcast %21 : vector<1x64xf32> to vector<16x64xf32>
    %23 = arith.addf %20, %22 : vector<16x64xf32>
    %cst_14 = arith.constant 0.000000e+00 : f32
    %24 = vector.broadcast %cst_14 : f32 to vector<16x64xf32>
    %25 = arith.cmpf oge, %23, %24 : vector<16x64xf32>
    %cst_15 = arith.constant 1.000000e-01 : f32
    %26 = vector.broadcast %cst_15 : f32 to vector<16x64xf32>
    %27 = arith.mulf %26, %23 : vector<16x64xf32>
    %28 = arith.select %25, %23, %27 : vector<16x64xi1>, vector<16x64xf32>
    %c0_16 = arith.constant 0 : index
    %c0_17 = arith.constant 0 : index
    %c0_18 = arith.constant 0 : index
    %29 = vector.load %arg4[%c0_16, %c0_17, %c0_18] : memref<1x16x64xf32, #tpu.memory_space<vmem>>, vector<1x16x64xf32>
    %30 = vector.shape_cast %29 : vector<1x16x64xf32> to vector<16x64xf32>
    %31 = vector.shape_cast %28 : vector<16x64xf32> to vector<1x16x64xf32>
    tpu.vector_store %arg4[%c0_16, %c0_17, %c0_18], %31 {strides = array<i32>} : memref<1x16x64xf32, #tpu.memory_space<vmem>>, vector<1x16x64xf32>,
    return
  }
  func.func @transform_0(%arg0: i32) -> (i32, i32, i32) {
    %c0_i32 = arith.constant 0 : i32
    %c0_i32_0 = arith.constant 0 : i32
    %c0_i32_1 = arith.constant 0 : i32
    return %arg0, %c0_i32, %c0_i32_0 : i32, i32, i32
  }
  func.func @transform_1(%arg0: i32) -> (i32, i32, i32) {
    %c0_i32 = arith.constant 0 : i32
    %c0_i32_0 = arith.constant 0 : i32
    %c0_i32_1 = arith.constant 0 : i32
    %c0_i32_2 = arith.constant 0 : i32
    return %c0_i32, %c0_i32_0, %c0_i32_1 : i32, i32, i32
  }
  func.func @transform_2(%arg0: i32) -> (i32, i32) {
    %c0_i32 = arith.constant 0 : i32
    %c0_i32_0 = arith.constant 0 : i32
    %c0_i32_1 = arith.constant 0 : i32
    return %c0_i32, %c0_i32_0 : i32, i32
  }
  func.func @transform_3(%arg0: i32) -> (i32, i32, i32) {
    %c0_i32 = arith.constant 0 : i32
    %c0_i32_0 = arith.constant 0 : i32
    %c0_i32_1 = arith.constant 0 : i32
    return %arg0, %c0_i32, %c0_i32_0 : i32, i32, i32
  }
}

module attributes {stable_mosaic.version = 11 : i64} {
  func.func @_maxpool_concat_kernel(%arg0: i32, %arg1: memref<1x16x8x16xf32, #tpu.memory_space<vmem>>, %arg2: memref<1x16x8x16xf32, #tpu.memory_space<vmem>>, %arg3: memref<1x8x8x16xf32, #tpu.memory_space<vmem>>) attributes {dimension_semantics = [#tpu.dimension_semantics<parallel>], iteration_bounds = array<i64: 2>, scalar_prefetch = 0 : i64, scratch_operands = 0 : i64, tpu.core_type = #tpu.core_type<tc>, window_params = [{transform_indices = @transform_0, window_bounds = array<i64: 1, 16, 8, 16>}, {transform_indices = @transform_1, window_bounds = array<i64: 1, 16, 8, 16>}, {transform_indices = @transform_2, window_bounds = array<i64: 1, 8, 8, 16>}]} {
    %c0 = arith.constant 0 : index
    %c0_0 = arith.constant 0 : index
    %c0_1 = arith.constant 0 : index
    %c0_2 = arith.constant 0 : index
    %0 = vector.load %arg1[%c0, %c0_0, %c0_1, %c0_2] : memref<1x16x8x16xf32, #tpu.memory_space<vmem>>, vector<1x16x8x16xf32>
    %1 = vector.shape_cast %0 : vector<1x16x8x16xf32> to vector<16x8x16xf32>
    %2 = vector.extract_strided_slice %1 {offsets = [0, 0, 0], sizes = [16, 8, 8], strides = [1, 1, 1]} : vector<16x8x16xf32> to vector<16x8x8xf32>
    %3 = vector.extract_strided_slice %1 {offsets = [0, 0, 8], sizes = [16, 8, 8], strides = [1, 1, 1]} : vector<16x8x16xf32> to vector<16x8x8xf32>
    %4 = arith.maximumf %2, %3 : vector<16x8x8xf32>
    %5 = vector.shape_cast %4 : vector<16x8x8xf32> to vector<8x2x8x8xf32>
    %cst = arith.constant dense<0xFF800000> : vector<8x8x8xf32>
    %6 = vector.multi_reduction <maximumf>, %5, %cst [1] : vector<8x2x8x8xf32> to vector<8x8x8xf32>
    %c0_3 = arith.constant 0 : index
    %c0_4 = arith.constant 0 : index
    %c0_5 = arith.constant 0 : index
    %c0_6 = arith.constant 0 : index
    %7 = vector.load %arg3[%c0_3, %c0_4, %c0_5, %c0_6] : memref<1x8x8x16xf32, #tpu.memory_space<vmem>>, vector<1x8x8x8xf32>
    %8 = vector.shape_cast %7 : vector<1x8x8x8xf32> to vector<8x8x8xf32>
    %9 = vector.shape_cast %6 : vector<8x8x8xf32> to vector<1x8x8x8xf32>
    tpu.vector_store %arg3[%c0_3, %c0_4, %c0_5, %c0_6], %9 {strides = array<i32>} : memref<1x8x8x16xf32, #tpu.memory_space<vmem>>, vector<1x8x8x8xf32>,
    %c0_7 = arith.constant 0 : index
    %c0_8 = arith.constant 0 : index
    %c0_9 = arith.constant 0 : index
    %c0_10 = arith.constant 0 : index
    %10 = vector.load %arg2[%c0_7, %c0_8, %c0_9, %c0_10] : memref<1x16x8x16xf32, #tpu.memory_space<vmem>>, vector<1x16x8x16xf32>
    %11 = vector.shape_cast %10 : vector<1x16x8x16xf32> to vector<16x8x16xf32>
    %12 = vector.extract_strided_slice %11 {offsets = [0, 0, 0], sizes = [16, 8, 8], strides = [1, 1, 1]} : vector<16x8x16xf32> to vector<16x8x8xf32>
    %13 = vector.extract_strided_slice %11 {offsets = [0, 0, 8], sizes = [16, 8, 8], strides = [1, 1, 1]} : vector<16x8x16xf32> to vector<16x8x8xf32>
    %14 = arith.maximumf %12, %13 : vector<16x8x8xf32>
    %15 = vector.shape_cast %14 : vector<16x8x8xf32> to vector<8x2x8x8xf32>
    %cst_11 = arith.constant dense<0xFF800000> : vector<8x8x8xf32>
    %16 = vector.multi_reduction <maximumf>, %15, %cst_11 [1] : vector<8x2x8x8xf32> to vector<8x8x8xf32>
    %c0_12 = arith.constant 0 : index
    %c0_13 = arith.constant 0 : index
    %c0_14 = arith.constant 0 : index
    %c8 = arith.constant 8 : index
    %17 = vector.load %arg3[%c0_12, %c0_13, %c0_14, %c8] : memref<1x8x8x16xf32, #tpu.memory_space<vmem>>, vector<1x8x8x8xf32>
    %18 = vector.shape_cast %17 : vector<1x8x8x8xf32> to vector<8x8x8xf32>
    %19 = vector.shape_cast %16 : vector<8x8x8xf32> to vector<1x8x8x8xf32>
    tpu.vector_store %arg3[%c0_12, %c0_13, %c0_14, %c8], %19 {strides = array<i32>} : memref<1x8x8x16xf32, #tpu.memory_space<vmem>>, vector<1x8x8x8xf32>,
    return
  }
  func.func @transform_0(%arg0: i32) -> (i32, i32, i32, i32) {
    %c0_i32 = arith.constant 0 : i32
    %c0_i32_0 = arith.constant 0 : i32
    %c0_i32_1 = arith.constant 0 : i32
    %c0_i32_2 = arith.constant 0 : i32
    return %arg0, %c0_i32, %c0_i32_0, %c0_i32_1 : i32, i32, i32, i32
  }
  func.func @transform_1(%arg0: i32) -> (i32, i32, i32, i32) {
    %c0_i32 = arith.constant 0 : i32
    %c0_i32_0 = arith.constant 0 : i32
    %c0_i32_1 = arith.constant 0 : i32
    %c0_i32_2 = arith.constant 0 : i32
    return %arg0, %c0_i32, %c0_i32_0, %c0_i32_1 : i32, i32, i32, i32
  }
  func.func @transform_2(%arg0: i32) -> (i32, i32, i32, i32) {
    %c0_i32 = arith.constant 0 : i32
    %c0_i32_0 = arith.constant 0 : i32
    %c0_i32_1 = arith.constant 0 : i32
    %c0_i32_2 = arith.constant 0 : i32
    return %arg0, %c0_i32, %c0_i32_0, %c0_i32_1 : i32, i32, i32, i32
  }
}

</mosaic_0001>

<bundles_post_ra>
// kernel: resblock_body_forward.7
= control target key start
LH: loop header
LB: loop body
LE: loop exit
PB: predicated region body
PF: predicated region fallthrough
CT: control target
= control target key end

     0   :  { %s646_s12 = smov 0   ;;  %s717_s0 = inlined_call_operand.vmem [shape: f32[2,16,64], index: 0, kind: input, shape index: {}]   ;;  %s718_s1 = inlined_call_operand.vmem [shape: bf16[3,64,64], index: 1, kind: input, shape index: {}]   ;;  %s719_s2 = inlined_call_operand.vmem [shape: f32[1,64], index: 2, kind: input, shape index: {}]   ;;  %s720_s3 = inlined_call_operand.vmem [shape: f32[2,16,64], index: 3, kind: output, shape index: {}]  }
   0x1 LB: > { %s498_s13 = sadd.s32 4294967295, %s622_s12   ;;  %p502_p0 = scmp.ge.s32.totalorder %s622_s12, 1  ;;  %s622_s12 = sphi %s646_s12, %s13_s12  }
   0x2   : > { %p137_p1 = scmp.lt.s32.totalorder %s622_s12, 3 }
   0x4   : > { %p138_p2 = pnand %p502_p0, %p137_p1 }
   0x5   : > { %p161_p3 = scmp.lt.s32.totalorder (!%p138_p2), %s498_s13, 1 }
   0x6   : > { %141 = sbr.rel (%p138_p2) target bundleno = 249 (0xf9), region = 32 }
   0xb   : > { %v604_v0 = vld [vmem:[%s718_s1 + $0x38] sm:$0xff]   ;;  %v624_v1 = vmov 0.0   ;;  %v606_v3 = vld [vmem:[%s718_s1 + $0x30] sm:$0xff]   ;;  %vm625_vm0 = vmmov 0   ;;  %s722_s13 = smov (!%p161_p3, %s498_s13), 1  ;;  %v608_v5 = vld [vmem:[%s718_s1 + $0x28] sm:$0xff]  }
   0xc   : > { %558 = vmatprep.subr.bf16.mxu0 %v624_v1  ;;  %570 = vmatprep.subr.bf16.mxu1 %v624_v1  ;;  %v605_v2 = vld [vmem:[%s718_s1 + $0x18] sm:$0xff]   ;;  %v607_v4 = vld [vmem:[%s718_s1 + $0x10] sm:$0xff]   ;;  %s541_s24 = sshll.u32 %s722_s13, 4  ;;  %v609_v6 = vld [vmem:[%s718_s1 + $0x8] sm:$0xff]   ;;  %vm176_vm1 = vcmask 1040384   ;;  %vm233_vm2 = vcmask 523264  }
   0xd   : > { %559 = vmatpush3.bf16.msra.mxu0 %v604_v0  ;;  %566 = vmatprep.mubr.msk.bf16.mxu0 %vm625_vm0, %v624_v1  ;;  %s165_s29 = scalar_lea.vmem %s717_s0, %s541_s24  ;;  %v610_v10 = vld [vmem:[%s718_s1 + $0x20] sm:$0xff]   ;;  %v612_v17 = vld [vmem:[%s718_s1 + $0x58] sm:$0xff]   ;;  %v613_v18 = vld [vmem:[%s718_s1 + $0x50] sm:$0xff]   ;;  %vm183_vm3 = vcmask 1046528   ;;  %s170_s21 = scalar_lea.vmem %s720_s3, %s541_s24 }
   0xe   : > { %571 = vmatpush3.bf16.msra.mxu1 %v605_v2  ;;  %560 = vmatprep.subr.bf16.mxu0 %v624_v1  ;;  %v172_v7 = vld [vmem:[%s165_s29] sm:$0xff]  ;;  %v173_v8 = vld [vmem:[%s165_s29 + $0x8] sm:$0xff] }
   0xf   : > { %572 = vmatprep.subr.bf16.mxu1 %v624_v1  ;;  %578 = vmatprep.mubr.msk.bf16.mxu1 %vm625_vm0, %v624_v1  ;;  %v178_v9 = vrot.slane %v173_v8, 7  ;;  %v177_v11 = vrot.slane %v172_v7, 7  ;;  %v611_v12 = vld [vmem:[%s718_s1] sm:$0xff]   ;;  %v199_v15 = vpack.c.bf16 %v173_v8, %v172_v7  ;;  %v184_v19 = vrot.slane %v172_v7, 1  ;;  %v614_v21 = vld [vmem:[%s718_s1 + $0x48] sm:$0xff]  }
  0x10   : > { %v185_v20 = vrot.slane %v173_v8, 1  ;;  %v615_v22 = vld [vmem:[%s718_s1 + $0x40] sm:$0xff]  }
  0x11   : > { %561 = vmatpush3.bf16.msra.mxu0 %v606_v3  ;;  %v179_v13 = vsel %vm176_vm1, %v177_v11, %v178_v9  ;;  %v182_v14 = vsel %vm176_vm1, 0.0, %v177_v11  ;;  %v538_v36 = vld [vmem:[%s719_s2] ss:$0 sm:$0xff] }
  0x12   : > { %573 = vmatpush3.bf16.msra.mxu1 %v607_v4  ;;  %562 = vmatprep.subr.bf16.mxu0 %v624_v1  ;;  %v190_v16 = vpack.c.bf16 %v179_v13, %v182_v14  ;;  %v186_v23 = vsel %vm183_vm3, %v184_v19, %v185_v20  ;;  %v189_v24 = vsel %vm183_vm3, %v185_v20, 0.0 }
  0x13   : > { %574 = vmatprep.subr.bf16.mxu1 %v624_v1  ;;  %v346_v25 = vpack.c.bf16 %v189_v24, %v186_v23 }
  0x15   : > { %563 = vmatpush3.bf16.msra.mxu0 %v608_v5 }
  0x16   : > { %575 = vmatpush3.bf16.msra.mxu1 %v609_v6  ;;  %564 = vmatprep.subr.bf16.mxu0 %v624_v1 }
  0x17   : > { %576 = vmatprep.subr.bf16.mxu1 %v624_v1 }
  0x19   : > { %565 = vmatpush3.bf16.msra.mxu0 %v610_v10 }
  0x1a   : > { %577 = vmatpush3.bf16.msra.mxu1 %v611_v12  ;;  %582 = vmatprep.subr.bf16.mxu0 %v624_v1 }
  0x1c   : > { %567 = vmatmul.mubr.msk.bf16.vlgmr.msra.gmra.mxu0 %vm233_vm2, %v199_v15 }
  0x1d   : > { %579 = vmatmul.mubr.msk.bf16.vlgmr.msra.gmra.mxu1 %vm233_vm2, %v190_v16  ;;  %583 = vmatpush3.bf16.msra.mxu0 %v612_v17 }
  0x1e   : > { %584 = vmatprep.subr.bf16.mxu0 %v624_v1  ;;  %590 = vmatprep.mubr.msk.bf16.mxu0 %vm625_vm0, %v624_v1 }
  0x21   : > { %585 = vmatpush3.bf16.msra.mxu0 %v613_v18 }
  0x22   : > { %586 = vmatprep.subr.bf16.mxu0 %v624_v1 }
  0x25   : > { %587 = vmatpush3.bf16.msra.mxu0 %v614_v21 }
  0x26   : > { %588 = vmatprep.subr.bf16.mxu0 %v624_v1 }
  0x29   : > { %589 = vmatpush3.bf16.msra.mxu0 %v615_v22 }
  0x2c   : > { %591 = vmatmul.mubr.msk.bf16.vlgmr.msra.gmra.mxu0 %vm233_vm2, %v346_v25 }
  0xdc   : > { %v271_v26 = vpop.f32.mrf.mxu0 }
  0xdd   : > { %v339_v27 = vpop.f32.mrf.mxu1 }
  0xde   : > { %v568_v28 = vpop.f32.mrf.mxu0  ;;  %v340_v34 = vadd.f32 %v339_v27, %v271_v26 }
  0xdf   : > { %v580_v29 = vpop.f32.mrf.mxu1 }
  0xe0   : > { %v274_v30 = vpop.f32.mrf.mxu0 }
  0xe1   : > { %v342_v31 = vpop.f32.mrf.mxu1 }
  0xe2   : > { %v569_v32 = vpop.f32.mrf.mxu0  ;;  %v343_v39 = vadd.f32 %v342_v31, %v274_v30 }
  0xe3   : > { %v581_v33 = vpop.f32.mrf.mxu1 }
  0xec   : > { %v417_v35 = vpop.f32.mrf.mxu0 }
  0xed   : > { %v424_v37 = vadd.f32 %v417_v35, %v340_v34 }
  0xee   : > { %v592_v38 = vpop.f32.mrf.mxu0 }
  0xef   : > { %v433_v40 = vadd.f32 %v538_v36, %v424_v37 }
  0xf0   : > { %v420_v41 = vpop.f32.mrf.mxu0 }
  0xf1   : > { %vm435_vm4 = vcmp.ge.f32.partialorder %v433_v40, 0.0  ;;  %v437_v42 = vmul.f32 0.1, %v433_v40  ;;  %v425_v43 = vadd.f32 %v420_v41, %v343_v39 }
  0xf2   : > { %v593_v44 = vpop.f32.mrf.mxu0 }
  0xf3   : > { %v439_v45 = vsel %vm435_vm4, %v433_v40, %v437_v42  ;;  %v434_v46 = vadd.f32 %v538_v36, %v425_v43 }
  0xf4   : > { %441 = vst.msk [vmem:[%s170_s21] sm:$0xff] %vm233_vm2, %v439_v45 }
  0xf5   : > { %vm436_vm5 = vcmp.ge.f32.partialorder %v434_v46, 0.0  ;;  %v438_v47 = vmul.f32 0.1, %v434_v46 }
  0xf7   : > { %v440_v48 = vsel %vm436_vm5, %v434_v46, %v438_v47 }
  0xf8   : > { %442 = vst.msk [vmem:[%s170_s21 + $0x8] sm:$0xff] %vm233_vm2, %v440_v48 }
  0xf9 PF: > { %s13_s12 = sadd.s32 1, %s622_s12  }
  0xfa   : > { %p10_p4 = scmp.ge.s32.totalorder %s13_s12, 4  }
  0xfc   :  { %12 = sbr.rel (!%p10_p4) target bundleno = 1 (0x1), region = 64 }

// kernel: resblock_body_forward.8
= control target key start
LH: loop header
LB: loop body
LE: loop exit
PB: predicated region body
PF: predicated region fallthrough
CT: control target
= control target key end

     0   :  { %s608_s18 = smov 0   ;;  %s660_s0 = inlined_call_operand.vmem [shape: f32[2,16,64], index: 0, kind: input, shape index: {}]   ;;  %s661_s1 = inlined_call_operand.vmem [shape: f32[2,16,64], index: 1, kind: input, shape index: {}]   ;;  %s662_s2 = inlined_call_operand.vmem [shape: bf16[64,128], index: 2, kind: input, shape index: {}]   ;;  %s663_s3 = inlined_call_operand.vmem [shape: bf16[64,128], index: 3, kind: input, shape index: {}]   ;;  %s664_s4 = inlined_call_operand.vmem [shape: f32[1,128], index: 4, kind: input, shape index: {}]   ;;  %s665_s5 = inlined_call_operand.vmem [shape: f32[2,16,128], index: 5, kind: output, shape index: {}]  }
   0x1 LB: > { %s489_s19 = sadd.s32 4294967295, %s574_s18   ;;  %p493_p0 = scmp.ge.s32.totalorder %s574_s18, 1  ;;  %s574_s18 = sphi %s608_s18, %s15_s18  }
   0x2   : > { %p197_p1 = scmp.lt.s32.totalorder %s574_s18, 3 }
   0x4   : > { %p198_p2 = pnand %p493_p0, %p197_p1 }
   0x5   : > { %p230_p3 = scmp.lt.s32.totalorder (!%p198_p2), %s489_s19, 1 }
   0x6   : > { %201 = sbr.rel (%p198_p2) target bundleno = 234 (0xea), region = 40 }
   0xb   : > { %v560_v0 = vld [vmem:[%s663_s3 + $0x18] sm:$0xff]   ;;  %v576_v1 = vmov 0.0   ;;  %v562_v3 = vld [vmem:[%s663_s3 + $0x10] sm:$0xff]   ;;  %vm577_vm0 = vmmov 0   ;;  %s667_s19 = smov (!%p230_p3, %s489_s19), 1  ;;  %v564_v5 = vld [vmem:[%s663_s3 + $0x8] sm:$0xff]  }
   0xc   : > { %526 = vmatprep.subr.bf16.mxu0 %v576_v1  ;;  %538 = vmatprep.subr.bf16.mxu1 %v576_v1  ;;  %v561_v2 = vld [vmem:[%s662_s2 + $0x18] sm:$0xff]   ;;  %v563_v4 = vld [vmem:[%s662_s2 + $0x10] sm:$0xff]   ;;  %s631_s30 = sshll.u32 %s667_s19, 4  ;;  %v565_v6 = vld [vmem:[%s662_s2 + $0x8] sm:$0xff]   ;;  %vm292_vm1 = vcmask 523264  }
   0xd   : > { %527 = vmatpush3.bf16.msra.mxu0 %v560_v0  ;;  %534 = vmatprep.mubr.msk.bf16.mxu0 %vm577_vm0, %v576_v1  ;;  %s239_s10 = scalar_lea.vmem %s661_s1, %s631_s30  ;;  %s234_s13 = scalar_lea.vmem %s660_s0, %s631_s30  ;;  %v566_v7 = vld [vmem:[%s663_s3] sm:$0xff]  }
   0xe   : > { %539 = vmatpush3.bf16.msra.mxu1 %v561_v2  ;;  %528 = vmatprep.subr.bf16.mxu0 %v576_v1  ;;  %v257_v8 = vld [vmem:[%s239_s10] sm:$0xff]  ;;  %v258_v9 = vld [vmem:[%s239_s10 + $0x8] sm:$0xff]  ;;  %s244_s23 = scalar_lea.vmem %s665_s5, %s631_s30 }
   0xf   : > { %540 = vmatprep.subr.bf16.mxu1 %v576_v1  ;;  %546 = vmatprep.mubr.msk.bf16.mxu1 %vm577_vm0, %v576_v1  ;;  %v567_v10 = vld [vmem:[%s662_s2] sm:$0xff]   ;;  %v247_v12 = vld [vmem:[%s234_s13 + $0x8] sm:$0xff]  ;;  %v259_v13 = vpack.c.bf16 %v258_v9, %v257_v8 }
  0x10   : > { %v246_v11 = vld [vmem:[%s234_s13] sm:$0xff] }
  0x11   : > { %529 = vmatpush3.bf16.msra.mxu0 %v562_v3  ;;  %v248_v14 = vpack.c.bf16 %v247_v12, %v246_v11  ;;  %v510_v17 = vld [vmem:[%s664_s4] ss:$0 sm:$0xff] }
  0x12   : > { %541 = vmatpush3.bf16.msra.mxu1 %v563_v4  ;;  %530 = vmatprep.subr.bf16.mxu0 %v576_v1 }
  0x13   : > { %542 = vmatprep.subr.bf16.mxu1 %v576_v1 }
  0x15   : > { %531 = vmatpush3.bf16.msra.mxu0 %v564_v5 }
  0x16   : > { %543 = vmatpush3.bf16.msra.mxu1 %v565_v6  ;;  %532 = vmatprep.subr.bf16.mxu0 %v576_v1 }
  0x17   : > { %544 = vmatprep.subr.bf16.mxu1 %v576_v1 }
  0x19   : > { %533 = vmatpush3.bf16.msra.mxu0 %v566_v7 }
  0x1a   : > { %545 = vmatpush3.bf16.msra.mxu1 %v567_v10 }
  0x1c   : > { %535 = vmatmul.mubr.msk.bf16.vlgmr.msra.gmra.mxu0 %vm292_vm1, %v259_v13 }
  0x1d   : > { %547 = vmatmul.mubr.msk.bf16.vlgmr.msra.gmra.mxu1 %vm292_vm1, %v248_v14 }
  0xdc   : > { %v330_v15 = vpop.f32.mrf.mxu0 }
  0xdd   : > { %v398_v16 = vpop.f32.mrf.mxu1 }
  0xde   : > { %v399_v18 = vadd.f32 %v398_v16, %v330_v15  ;;  %v536_v19 = vpop.f32.mrf.mxu0 }
  0xdf   : > { %v548_v20 = vpop.f32.mrf.mxu1 }
  0xe0   : > { %v412_v21 = vadd.f32 %v510_v17, %v399_v18  ;;  %v333_v22 = vpop.f32.mrf.mxu0 }
  0xe1   : > { %v401_v23 = vpop.f32.mrf.mxu1 }
  0xe2   : > { %vm414_vm2 = vcmp.ge.f32.partialorder %v412_v21, 0.0  ;;  %v416_v24 = vmul.f32 0.1, %v412_v21  ;;  %v402_v25 = vadd.f32 %v401_v23, %v333_v22  ;;  %v537_v26 = vpop.f32.mrf.mxu0 }
  0xe3   : > { %v549_v27 = vpop.f32.mrf.mxu1 }
  0xe4   : > { %v418_v28 = vsel %vm414_vm2, %v412_v21, %v416_v24  ;;  %v413_v29 = vadd.f32 %v510_v17, %v402_v25 }
  0xe5   : > { %420 = vst [vmem:[%s244_s23] sm:$0xff] %v418_v28 }
  0xe6   : > { %vm415_vm3 = vcmp.ge.f32.partialorder %v413_v29, 0.0  ;;  %v417_v30 = vmul.f32 0.1, %v413_v29 }
  0xe8   : > { %v419_v31 = vsel %vm415_vm3, %v413_v29, %v417_v30 }
  0xe9   : > { %421 = vst [vmem:[%s244_s23 + $0x8] sm:$0xff] %v419_v31 }
  0xea PF: > { %s15_s18 = sadd.s32 1, %s574_s18  }
  0xeb   : > { %p12_p4 = scmp.ge.s32.totalorder %s15_s18, 4  }
  0xed   :  { %14 = sbr.rel (!%p12_p4) target bundleno = 1 (0x1), region = 73 }

// kernel: resblock_body_forward.5
= control target key start
LH: loop header
LB: loop body
LE: loop exit
PB: predicated region body
PF: predicated region fallthrough
CT: control target
= control target key end

     0   :  { %s646_s12 = smov 0   ;;  %s715_s0 = inlined_call_operand.vmem [shape: f32[2,16,64], index: 0, kind: input, shape index: {}]   ;;  %s716_s1 = inlined_call_operand.vmem [shape: bf16[3,64,128], index: 1, kind: input, shape index: {}]   ;;  %s717_s2 = inlined_call_operand.vmem [shape: f32[1,128], index: 2, kind: input, shape index: {}]   ;;  %s718_s3 = inlined_call_operand.vmem [shape: f32[2,16,128], index: 3, kind: output, shape index: {}]  }
   0x1 LB: > { %s498_s13 = sadd.s32 4294967295, %s622_s12   ;;  %p502_p0 = scmp.ge.s32.totalorder %s622_s12, 1  ;;  %s622_s12 = sphi %s646_s12, %s13_s12  }
   0x2   : > { %p137_p1 = scmp.lt.s32.totalorder %s622_s12, 3 }
   0x4   : > { %p138_p2 = pnand %p502_p0, %p137_p1 }
   0x5   : > { %p161_p3 = scmp.lt.s32.totalorder (!%p138_p2), %s498_s13, 1 }
   0x6   : > { %141 = sbr.rel (%p138_p2) target bundleno = 249 (0xf9), region = 32 }
   0xb   : > { %v604_v0 = vld [vmem:[%s716_s1 + $0x38] sm:$0xff]   ;;  %v624_v1 = vmov 0.0   ;;  %v606_v3 = vld [vmem:[%s716_s1 + $0x30] sm:$0xff]   ;;  %vm625_vm0 = vmmov 0   ;;  %s720_s13 = smov (!%p161_p3, %s498_s13), 1  ;;  %v608_v5 = vld [vmem:[%s716_s1 + $0x28] sm:$0xff]  }
   0xc   : > { %558 = vmatprep.subr.bf16.mxu0 %v624_v1  ;;  %570 = vmatprep.subr.bf16.mxu1 %v624_v1  ;;  %v605_v2 = vld [vmem:[%s716_s1 + $0x18] sm:$0xff]   ;;  %v607_v4 = vld [vmem:[%s716_s1 + $0x10] sm:$0xff]   ;;  %s541_s24 = sshll.u32 %s720_s13, 4  ;;  %v609_v6 = vld [vmem:[%s716_s1 + $0x8] sm:$0xff]   ;;  %vm176_vm1 = vcmask 1040384   ;;  %vm233_vm2 = vcmask 523264  }
   0xd   : > { %559 = vmatpush3.bf16.msra.mxu0 %v604_v0  ;;  %566 = vmatprep.mubr.msk.bf16.mxu0 %vm625_vm0, %v624_v1  ;;  %s165_s29 = scalar_lea.vmem %s715_s0, %s541_s24  ;;  %v610_v10 = vld [vmem:[%s716_s1 + $0x20] sm:$0xff]   ;;  %v612_v17 = vld [vmem:[%s716_s1 + $0x58] sm:$0xff]   ;;  %v613_v18 = vld [vmem:[%s716_s1 + $0x50] sm:$0xff]   ;;  %vm183_vm3 = vcmask 1046528   ;;  %s170_s21 = scalar_lea.vmem %s718_s3, %s541_s24 }
   0xe   : > { %571 = vmatpush3.bf16.msra.mxu1 %v605_v2  ;;  %560 = vmatprep.subr.bf16.mxu0 %v624_v1  ;;  %v172_v7 = vld [vmem:[%s165_s29] sm:$0xff]  ;;  %v173_v8 = vld [vmem:[%s165_s29 + $0x8] sm:$0xff] }
   0xf   : > { %572 = vmatprep.subr.bf16.mxu1 %v624_v1  ;;  %578 = vmatprep.mubr.msk.bf16.mxu1 %vm625_vm0, %v624_v1  ;;  %v178_v9 = vrot.slane %v173_v8, 7  ;;  %v177_v11 = vrot.slane %v172_v7, 7  ;;  %v611_v12 = vld [vmem:[%s716_s1] sm:$0xff]   ;;  %v199_v15 = vpack.c.bf16 %v173_v8, %v172_v7  ;;  %v184_v19 = vrot.slane %v172_v7, 1  ;;  %v614_v21 = vld [vmem:[%s716_s1 + $0x48] sm:$0xff]  }
  0x10   : > { %v185_v20 = vrot.slane %v173_v8, 1  ;;  %v615_v22 = vld [vmem:[%s716_s1 + $0x40] sm:$0xff]  }
  0x11   : > { %561 = vmatpush3.bf16.msra.mxu0 %v606_v3  ;;  %v179_v13 = vsel %vm176_vm1, %v177_v11, %v178_v9  ;;  %v182_v14 = vsel %vm176_vm1, 0.0, %v177_v11  ;;  %v538_v36 = vld [vmem:[%s717_s2] ss:$0 sm:$0xff] }
  0x12   : > { %573 = vmatpush3.bf16.msra.mxu1 %v607_v4  ;;  %562 = vmatprep.subr.bf16.mxu0 %v624_v1  ;;  %v190_v16 = vpack.c.bf16 %v179_v13, %v182_v14  ;;  %v186_v23 = vsel %vm183_vm3, %v184_v19, %v185_v20  ;;  %v189_v24 = vsel %vm183_vm3, %v185_v20, 0.0 }
  0x13   : > { %574 = vmatprep.subr.bf16.mxu1 %v624_v1  ;;  %v346_v25 = vpack.c.bf16 %v189_v24, %v186_v23 }
  0x15   : > { %563 = vmatpush3.bf16.msra.mxu0 %v608_v5 }
  0x16   : > { %575 = vmatpush3.bf16.msra.mxu1 %v609_v6  ;;  %564 = vmatprep.subr.bf16.mxu0 %v624_v1 }
  0x17   : > { %576 = vmatprep.subr.bf16.mxu1 %v624_v1 }
  0x19   : > { %565 = vmatpush3.bf16.msra.mxu0 %v610_v10 }
  0x1a   : > { %577 = vmatpush3.bf16.msra.mxu1 %v611_v12  ;;  %582 = vmatprep.subr.bf16.mxu0 %v624_v1 }
  0x1c   : > { %567 = vmatmul.mubr.msk.bf16.vlgmr.msra.gmra.mxu0 %vm233_vm2, %v199_v15 }
  0x1d   : > { %579 = vmatmul.mubr.msk.bf16.vlgmr.msra.gmra.mxu1 %vm233_vm2, %v190_v16  ;;  %583 = vmatpush3.bf16.msra.mxu0 %v612_v17 }
  0x1e   : > { %584 = vmatprep.subr.bf16.mxu0 %v624_v1  ;;  %590 = vmatprep.mubr.msk.bf16.mxu0 %vm625_vm0, %v624_v1 }
  0x21   : > { %585 = vmatpush3.bf16.msra.mxu0 %v613_v18 }
  0x22   : > { %586 = vmatprep.subr.bf16.mxu0 %v624_v1 }
  0x25   : > { %587 = vmatpush3.bf16.msra.mxu0 %v614_v21 }
  0x26   : > { %588 = vmatprep.subr.bf16.mxu0 %v624_v1 }
  0x29   : > { %589 = vmatpush3.bf16.msra.mxu0 %v615_v22 }
  0x2c   : > { %591 = vmatmul.mubr.msk.bf16.vlgmr.msra.gmra.mxu0 %vm233_vm2, %v346_v25 }
  0xdc   : > { %v271_v26 = vpop.f32.mrf.mxu0 }
  0xdd   : > { %v339_v27 = vpop.f32.mrf.mxu1 }
  0xde   : > { %v568_v28 = vpop.f32.mrf.mxu0  ;;  %v340_v34 = vadd.f32 %v339_v27, %v271_v26 }
  0xdf   : > { %v580_v29 = vpop.f32.mrf.mxu1 }
  0xe0   : > { %v274_v30 = vpop.f32.mrf.mxu0 }
  0xe1   : > { %v342_v31 = vpop.f32.mrf.mxu1 }
  0xe2   : > { %v569_v32 = vpop.f32.mrf.mxu0  ;;  %v343_v39 = vadd.f32 %v342_v31, %v274_v30 }
  0xe3   : > { %v581_v33 = vpop.f32.mrf.mxu1 }
  0xec   : > { %v417_v35 = vpop.f32.mrf.mxu0 }
  0xed   : > { %v424_v37 = vadd.f32 %v417_v35, %v340_v34 }
  0xee   : > { %v592_v38 = vpop.f32.mrf.mxu0 }
  0xef   : > { %v433_v40 = vadd.f32 %v538_v36, %v424_v37 }
  0xf0   : > { %v420_v41 = vpop.f32.mrf.mxu0 }
  0xf1   : > { %vm435_vm4 = vcmp.ge.f32.partialorder %v433_v40, 0.0  ;;  %v437_v42 = vmul.f32 0.1, %v433_v40  ;;  %v425_v43 = vadd.f32 %v420_v41, %v343_v39 }
  0xf2   : > { %v593_v44 = vpop.f32.mrf.mxu0 }
  0xf3   : > { %v439_v45 = vsel %vm435_vm4, %v433_v40, %v437_v42  ;;  %v434_v46 = vadd.f32 %v538_v36, %v425_v43 }
  0xf4   : > { %441 = vst [vmem:[%s170_s21] sm:$0xff] %v439_v45 }
  0xf5   : > { %vm436_vm5 = vcmp.ge.f32.partialorder %v434_v46, 0.0  ;;  %v438_v47 = vmul.f32 0.1, %v434_v46 }
  0xf7   : > { %v440_v48 = vsel %vm436_vm5, %v434_v46, %v438_v47 }
  0xf8   : > { %442 = vst [vmem:[%s170_s21 + $0x8] sm:$0xff] %v440_v48 }
  0xf9 PF: > { %s13_s12 = sadd.s32 1, %s622_s12  }
  0xfa   : > { %p10_p4 = scmp.ge.s32.totalorder %s13_s12, 4  }
  0xfc   :  { %12 = sbr.rel (!%p10_p4) target bundleno = 1 (0x1), region = 64 }

// kernel: resblock_body_forward.6
= control target key start
LH: loop header
LB: loop body
LE: loop exit
PB: predicated region body
PF: predicated region fallthrough
CT: control target
= control target key end

     0   :  { %s815_s12 = smov 0   ;;  %s946_s0 = inlined_call_operand.vmem [shape: f32[2,16,128], index: 0, kind: input, shape index: {}]   ;;  %s947_s1 = inlined_call_operand.vmem [shape: bf16[3,128,64], index: 1, kind: input, shape index: {}]   ;;  %s948_s2 = inlined_call_operand.vmem [shape: f32[1,64], index: 2, kind: input, shape index: {}]   ;;  %s949_s3 = inlined_call_operand.vmem [shape: f32[2,16,64], index: 3, kind: output, shape index: {}]  }
   0x1 LB: > { %s585_s13 = sadd.s32 4294967295, %s790_s12   ;;  %p589_p0 = scmp.ge.s32.totalorder %s790_s12, 1  ;;  %s790_s12 = sphi %s815_s12, %s13_s12  }
   0x2   : > { %p137_p1 = scmp.lt.s32.totalorder %s790_s12, 3 }
   0x4   : > { %p138_p2 = pnand %p589_p0, %p137_p1 }
   0x5   : > { %p161_p3 = scmp.lt.s32.totalorder (!%p138_p2), %s585_s13, 1 }
   0x6   : > { %141 = sbr.rel (%p138_p2) target bundleno = 281 (0x119), region = 32 }
   0xb   : > { %v760_v0 = vld [vmem:[%s947_s1 + $0x78] sm:$0xff]   ;;  %v792_v1 = vmov 0.0   ;;  %v762_v3 = vld [vmem:[%s947_s1 + $0x70] sm:$0xff]   ;;  %vm793_vm0 = vmmov 0   ;;  %v764_v5 = vld [vmem:[%s947_s1 + $0x68] sm:$0xff]   ;;  %s951_s13 = smov (!%p161_p3, %s585_s13), 1 }
   0xc   : > { %689 = vmatprep.subr.bf16.mxu0 %v792_v1  ;;  %709 = vmatprep.subr.bf16.mxu1 %v792_v1  ;;  %v761_v2 = vld [vmem:[%s947_s1 + $0x38] sm:$0xff]   ;;  %v763_v4 = vld [vmem:[%s947_s1 + $0x30] sm:$0xff]   ;;  %v765_v6 = vld [vmem:[%s947_s1 + $0x28] sm:$0xff]   ;;  %s660_s30 = sshll.u32 %s951_s13, 4  ;;  %vm176_vm1 = vcmask 1040384   ;;  %vm794_vm3 = vmmov 1  }
   0xd   : > { %690 = vmatpush3.bf16.msra.mxu0 %v760_v0  ;;  %705 = vmatprep.mubr.msk.bf16.mxu0 %vm793_vm0, %v792_v1  ;;  %v766_v7 = vld [vmem:[%s947_s1 + $0x60] sm:$0xff]   ;;  %v768_v9 = vld [vmem:[%s947_s1 + $0x58] sm:$0xff]   ;;  %s165_s10 = scalar_lea.vmem %s946_s0, %s660_s30  ;;  %v770_v11 = vld [vmem:[%s947_s1 + $0x50] sm:$0xff]   ;;  %vm183_vm5 = vcmask 1046528   ;;  %s170_s21 = scalar_lea.vmem %s949_s3, %s660_s30  ;;  %vm527_vm8 = vcmask 523264  }
   0xe   : > { %710 = vmatpush3.bf16.msra.mxu1 %v761_v2  ;;  %691 = vmatprep.subr.bf16.mxu0 %v792_v1  ;;  %v767_v8 = vld [vmem:[%s947_s1 + $0x20] sm:$0xff]   ;;  %v769_v10 = vld [vmem:[%s947_s1 + $0x18] sm:$0xff]   ;;  %v771_v12 = vld [vmem:[%s947_s1 + $0x10] sm:$0xff]  }
   0xf   : > { %711 = vmatprep.subr.bf16.mxu1 %v792_v1  ;;  %725 = vmatprep.mubr.msk.bf16.mxu1 %vm793_vm0, %v792_v1  ;;  %v172_v13 = vld [vmem:[%s165_s10] sm:$0xff]  ;;  %v173_v14 = vld [vmem:[%s165_s10 + $0x8] sm:$0xff]  ;;  %vm626_vm2 = vmneg %vm176_vm1 }
  0x10   : > { %v772_v15 = vld [vmem:[%s947_s1 + $0x48] sm:$0xff]   ;;  %v177_v17 = vrot.slane %v172_v13, 7  ;;  %v178_v18 = vrot.slane %v173_v14, 7  ;;  %v774_v19 = vld [vmem:[%s947_s1 + $0x40] sm:$0xff]   ;;  %v207_v22 = vpack.c.bf16 %v173_v14, %v172_v13  ;;  %v776_v24 = vld [vmem:[%s947_s1 + $0xb8] sm:$0xff]   ;;  %v184_v30 = vrot.slane %v172_v13, 1 }
  0x11   : > { %692 = vmatpush3.bf16.msra.mxu0 %v762_v3  ;;  %v773_v16 = vld [vmem:[%s947_s1 + $0x8] sm:$0xff]   ;;  %v775_v20 = vld [vmem:[%s947_s1] sm:$0xff]   ;;  %vm627_vm4 = vmpackc.low %vm794_vm3, %vm626_vm2  ;;  %v185_v31 = vrot.slane %v173_v14, 1 }
  0x12   : > { %712 = vmatpush3.bf16.msra.mxu1 %v763_v4  ;;  %693 = vmatprep.subr.bf16.mxu0 %v792_v1  ;;  %v179_v21 = vsel %vm176_vm1, %v177_v17, %v178_v18  ;;  %v777_v25 = vld [vmem:[%s947_s1 + $0xb0] sm:$0xff]   ;;  %v778_v26 = vld [vmem:[%s947_s1 + $0xa8] sm:$0xff]   ;;  %v779_v27 = vld [vmem:[%s947_s1 + $0xa0] sm:$0xff]  }
  0x13   : > { %713 = vmatprep.subr.bf16.mxu1 %v792_v1  ;;  %v628_v23 = vpack.c.bf16 %v179_v21, %v177_v17  ;;  %v780_v28 = vld [vmem:[%s947_s1 + $0x98] sm:$0xff]   ;;  %v781_v29 = vld [vmem:[%s947_s1 + $0x90] sm:$0xff]   ;;  %v782_v32 = vld [vmem:[%s947_s1 + $0x88] sm:$0xff]   ;;  %v186_v33 = vsel %vm183_vm5, %v184_v30, %v185_v31 }
  0x14   : > { %v783_v34 = vld [vmem:[%s947_s1 + $0x80] sm:$0xff]   ;;  %v655_v35 = vpack.c.bf16 %v185_v31, %v186_v33  ;;  %vm654_vm6 = vmpackc.low %vm183_vm5, %vm794_vm3 }
  0x15   : > { %694 = vmatpush3.bf16.msra.mxu0 %v764_v5  ;;  %v657_v46 = vld [vmem:[%s948_s2] ss:$0 sm:$0xff] }
  0x16   : > { %714 = vmatpush3.bf16.msra.mxu1 %v765_v6  ;;  %695 = vmatprep.subr.bf16.mxu0 %v792_v1 }
  0x17   : > { %715 = vmatprep.subr.bf16.mxu1 %v792_v1 }
  0x19   : > { %696 = vmatpush3.bf16.msra.mxu0 %v766_v7 }
  0x1a   : > { %716 = vmatpush3.bf16.msra.mxu1 %v767_v8  ;;  %697 = vmatprep.subr.bf16.mxu0 %v792_v1 }
  0x1b   : > { %717 = vmatprep.subr.bf16.mxu1 %v792_v1 }
  0x1d   : > { %698 = vmatpush3.bf16.msra.mxu0 %v768_v9 }
  0x1e   : > { %718 = vmatpush3.bf16.msra.mxu1 %v769_v10  ;;  %699 = vmatprep.subr.bf16.mxu0 %v792_v1 }
  0x1f   : > { %719 = vmatprep.subr.bf16.mxu1 %v792_v1 }
  0x21   : > { %700 = vmatpush3.bf16.msra.mxu0 %v770_v11 }
  0x22   : > { %720 = vmatpush3.bf16.msra.mxu1 %v771_v12  ;;  %701 = vmatprep.subr.bf16.mxu0 %v792_v1 }
  0x23   : > { %721 = vmatprep.subr.bf16.mxu1 %v792_v1 }
  0x25   : > { %702 = vmatpush3.bf16.msra.mxu0 %v772_v15 }
  0x26   : > { %722 = vmatpush3.bf16.msra.mxu1 %v773_v16  ;;  %703 = vmatprep.subr.bf16.mxu0 %v792_v1 }
  0x27   : > { %723 = vmatprep.subr.bf16.mxu1 %v792_v1 }
  0x29   : > { %704 = vmatpush3.bf16.msra.mxu0 %v774_v19 }
  0x2a   : > { %724 = vmatpush3.bf16.msra.mxu1 %v775_v20  ;;  %729 = vmatprep.subr.bf16.mxu0 %v792_v1 }
  0x2c   : > { %706 = vmatmul.mubr.bf16.vlgmr.msra.gmra.mxu0 %v207_v22 }
  0x2d   : > { %726 = vmatmul.mubr.msk.bf16.vlgmr.msra.gmra.mxu1 %vm627_vm4, %v628_v23  ;;  %730 = vmatpush3.bf16.msra.mxu0 %v776_v24 }
  0x2e   : > { %731 = vmatprep.subr.bf16.mxu0 %v792_v1  ;;  %745 = vmatprep.mubr.msk.bf16.mxu0 %vm793_vm0, %v792_v1 }
  0x31   : > { %732 = vmatpush3.bf16.msra.mxu0 %v777_v25 }
  0x32   : > { %733 = vmatprep.subr.bf16.mxu0 %v792_v1 }
  0x35   : > { %734 = vmatpush3.bf16.msra.mxu0 %v778_v26 }
  0x36   : > { %735 = vmatprep.subr.bf16.mxu0 %v792_v1 }
  0x39   : > { %736 = vmatpush3.bf16.msra.mxu0 %v779_v27 }
  0x3a   : > { %737 = vmatprep.subr.bf16.mxu0 %v792_v1 }
  0x3d   : > { %738 = vmatpush3.bf16.msra.mxu0 %v780_v28 }
  0x3e   : > { %739 = vmatprep.subr.bf16.mxu0 %v792_v1 }
  0x41   : > { %740 = vmatpush3.bf16.msra.mxu0 %v781_v29 }
  0x42   : > { %741 = vmatprep.subr.bf16.mxu0 %v792_v1 }
  0x45   : > { %742 = vmatpush3.bf16.msra.mxu0 %v782_v32 }
  0x46   : > { %743 = vmatprep.subr.bf16.mxu0 %v792_v1 }
  0x49   : > { %744 = vmatpush3.bf16.msra.mxu0 %v783_v34 }
  0x4c   : > { %746 = vmatmul.mubr.msk.bf16.vlgmr.msra.gmra.mxu0 %vm654_vm6, %v655_v35 }
  0xec   : > { %v307_v36 = vpop.f32.mrf.mxu0 }
  0xed   : > { %v396_v37 = vpop.f32.mrf.mxu1 }
  0xee   : > { %v707_v38 = vpop.f32.mrf.mxu0  ;;  %v397_v44 = vadd.f32 %v396_v37, %v307_v36 }
  0xef   : > { %v727_v39 = vpop.f32.mrf.mxu1 }
  0xf0   : > { %v310_v40 = vpop.f32.mrf.mxu0 }
  0xf1   : > { %v399_v41 = vpop.f32.mrf.mxu1 }
  0xf2   : > { %v708_v42 = vpop.f32.mrf.mxu0  ;;  %v400_v49 = vadd.f32 %v399_v41, %v310_v40 }
  0xf3   : > { %v728_v43 = vpop.f32.mrf.mxu1 }
 0x10c   : > { %v503_v45 = vpop.f32.mrf.mxu0 }
 0x10d   : > { %v510_v47 = vadd.f32 %v503_v45, %v397_v44 }
 0x10e   : > { %v747_v48 = vpop.f32.mrf.mxu0 }
 0x10f   : > { %v519_v50 = vadd.f32 %v657_v46, %v510_v47 }
 0x110   : > { %v506_v51 = vpop.f32.mrf.mxu0 }
 0x111   : > { %vm521_vm7 = vcmp.ge.f32.partialorder %v519_v50, 0.0  ;;  %v523_v52 = vmul.f32 0.1, %v519_v50  ;;  %v511_v53 = vadd.f32 %v506_v51, %v400_v49 }
 0x112   : > { %v748_v54 = vpop.f32.mrf.mxu0 }
 0x113   : > { %v525_v55 = vsel %vm521_vm7, %v519_v50, %v523_v52  ;;  %v520_v56 = vadd.f32 %v657_v46, %v511_v53 }
 0x114   : > { %528 = vst.msk [vmem:[%s170_s21] sm:$0xff] %vm527_vm8, %v525_v55 }
 0x115   : > { %vm522_vm9 = vcmp.ge.f32.partialorder %v520_v56, 0.0  ;;  %v524_v57 = vmul.f32 0.1, %v520_v56 }
 0x117   : > { %v526_v58 = vsel %vm522_vm9, %v520_v56, %v524_v57 }
 0x118   : > { %529 = vst.msk [vmem:[%s170_s21 + $0x8] sm:$0xff] %vm527_vm8, %v526_v58 }
 0x119 PF: > { %s13_s12 = sadd.s32 1, %s790_s12  }
 0x11a   : > { %p10_p4 = scmp.ge.s32.totalorder %s13_s12, 4  }
 0x11c   :  { %12 = sbr.rel (!%p10_p4) target bundleno = 1 (0x1), region = 64 }

// kernel: resblock_body_forward.9
= control target key start
LH: loop header
LB: loop body
LE: loop exit
PB: predicated region body
PF: predicated region fallthrough
CT: control target
= control target key end

     0   :  { %7 = vsyncpa [#allocation3], 0  ;;  %s1068_s0 = inlined_call_operand.vmem [shape: f32[2,16,8,16], index: 0, kind: input, shape index: {}]   ;;  %s1069_s1 = inlined_call_operand.vmem [shape: f32[2,16,8,16], index: 1, kind: input, shape index: {}]   ;;  %s1070_s2 = inlined_call_operand.hbm [shape: f32[2,8,8,16], index: 2, kind: output, shape index: {}]  }
   0x1   :  { %9 = vsyncpa [#allocation3 + $0x1], 0  ;;  %s680_s9 = smov 0   ;;  %s682_s10 = smov 0  }
   0x2   :  { %s684_s11 = smov 0   ;;  %s686_s12 = smov 0  }
   0x3 LB: > { %s701_s13 = sadd.s32 4294967295, %s659_s12   ;;  %s540_s14 = sadd.s32 4294967294, %s659_s12   ;;  %s659_s12 = sphi %s686_s12, %s1076_s12   ;;  %s655_s11 = sphi %s684_s11, %s1075_s11   ;;  %s651_s10 = sphi %s682_s10, %s1074_s10   ;;  %s647_s9 = sphi %s680_s9, %s1073_s9  }
   0x4   : > { %s705_s15 = sadd.s32 1, %s659_s12   ;;  %s74_s16 = sadd.s32 1, %s655_s11 }
   0x5   : > { %s71_s17 = ssub.s32 %s659_s12, %s705_s15  ;;  %p84_p0 = scmp.ne.s32.totalorder %s655_s11, %s651_s10 }
   0x6   : > { %p72_p1 = scmp.eq.s32.totalorder %s71_s17, 0  ;;  %p85_p2 = scmp.eq.s32.totalorder %s701_s13, 1 }
   0x7   : > { %p90_p3 = scmp.ne.s32.totalorder %s651_s10, %s647_s9  ;;  %p91_p4 = scmp.eq.s32.totalorder %s540_s14, 1 }
   0x8   : > { %s716_s18 = scalar_select %p72_p1, %s655_s11, %s74_s16  }
   0x9   : > { %p718_p5 = por %p85_p2, %p84_p0  ;;  %p722_p6 = por %p91_p4, %p90_p3 }
   0xa   : > { %p543_p7 = scmp.ge.s32.totalorder %s659_s12, 1  ;;  %p125_p8 = scmp.lt.s32.totalorder %s659_s12, 3 }
   0xc   : > { %p126_p9 = pnand %p543_p7, %p125_p8 }
   0xd   : > { %p152_p10 = scmp.lt.s32.totalorder (!%p126_p9), %s701_s13, 1  ;;  %s661_s26 = smov (!%p126_p9), 120  }
   0xe   : > { %129 = sbr.rel (%p126_p9) target bundleno = 301 (0x12d), region = 28  ;;  %s662_s30 = smov (!%p126_p9), 8  }
   0xf   : > { %s149_s3 = sand.u32 (!%p126_p9), 1, %s651_s10   ;;  %s556_s6 = sshll.u32 (!%p126_p9), %s701_s13, 10 }
  0x10   : > { %s544_s4 = sshll.u32 (!%p126_p9), %s149_s3, 6  ;;  %s1019_s16 = scalar_lea.hbm (!%p126_p9), %s1070_s2, %s556_s6 }
  0x11   : > { %s956_s5 = scalar_lea.vmem (!%p126_p9), [#allocation2], %s544_s4  ;;  %s1027_s17 = scalar_lea.sflag (!%p126_p9), [#allocation3], %s149_s3 }
  0x12   : > { %s466_s7 = sshll.u32 (!%p126_p9), %s956_s5, 4  ;;  %s1021_s7 = int_to_ptr.vmem [resolvable:$true] %s466_s7 }
  0x13   : > { %s730_s21 = scalar_select %p152_p10, %s701_s13, 1  ;;  %vm258_vm0 = vcmask 64512   ;;  %vm443_vm1 = vcmask 130112  }
  0x14   : > { %s599_s13 = scalar_lea.vmem %s1021_s7, 1024 }
  0x15   : > { %s554_s22 = sshll.u32 %s730_s21, 7  ;;  %p600_p11 = scmp.ne.s32.totalorder %s1021_s7, %s599_s13 }
  0x16   : > { %s738_s25 = scalar_lea.vmem %s1069_s1, %s554_s22  ;;  %s821_s29 = scalar_lea.vmem %s1068_s0, %s554_s22 }
  0x17   : > { %v741_v0 = vld [vmem:[%s738_s25 + $0x10] sm:$0xff]  ;;  %v744_v1 = vld [vmem:[%s738_s25] sm:$0xff]  ;;  %v751_v2 = vld [vmem:[%s738_s25 + $0x18] sm:$0xff]  ;;  %p601_p12 = pnand %p600_p11, %p718_p5  ;;  %s663_s21 = smov [#allocation2]  }
  0x18   : > { %327 = vrot.lane.b32.xlu1 %v741_v0, %s661_s26  ;;  %323 = vrot.lane.b32.xlu0 %v744_v1, %s661_s26  ;;  %v754_v3 = vld [vmem:[%s738_s25 + $0x8] sm:$0xff]  ;;  %v764_v5 = vld [vmem:[%s738_s25 + $0x20] sm:$0xff]  ;;  %s603_s22 = sshll.u32 %s663_s21, 4  ;;  %s604_s22 = int_to_ptr.vmem [resolvable:$false] %s603_s22 }
  0x19   : > { %v761_v4 = vld [vmem:[%s738_s25 + $0x28] sm:$0xff]  ;;  %v771_v6 = vld [vmem:[%s738_s25 + $0x38] sm:$0xff]  ;;  %v774_v7 = vld [vmem:[%s738_s25 + $0x30] sm:$0xff]  ;;  %p602_p13 = pneg %p601_p12  ;;  %s605_s23 = scalar_lea.vmem %s604_s22, 2048 }
  0x1a   : > { %v781_v8 = vld [vmem:[%s738_s25 + $0x48] sm:$0xff]  ;;  %v784_v9 = vld [vmem:[%s738_s25 + $0x40] sm:$0xff]  ;;  %v791_v10 = vld [vmem:[%s738_s25 + $0x58] sm:$0xff]  ;;  %p606_p0 = scmp.lt.s32.totalorder %s1021_s7, %s604_s22  ;;  %p607_p1 = scmp.lt.s32.totalorder %s605_s23, %s599_s13 }
  0x1b   : > { %v794_v11 = vld [vmem:[%s738_s25 + $0x50] sm:$0xff]  ;;  %v801_v12 = vld [vmem:[%s738_s25 + $0x68] sm:$0xff]  ;;  %v804_v13 = vld [vmem:[%s738_s25 + $0x60] sm:$0xff] }
  0x1c   : > { %329 = vrot.lane.b32.xlu1 %v751_v2, %s661_s26  ;;  %325 = vrot.lane.b32.xlu0 %v754_v3, %s661_s26  ;;  %v811_v14 = vld [vmem:[%s738_s25 + $0x78] sm:$0xff]  ;;  %v814_v15 = vld [vmem:[%s738_s25 + $0x70] sm:$0xff]  ;;  %p608_p2 = por %p607_p1, %p606_p0 }
  0x1d   : > { %v828_v16 = vld [vmem:[%s821_s29 + $0x8] sm:$0xff]  ;;  %v831_v17 = vld [vmem:[%s821_s29] sm:$0xff]  ;;  %v838_v18 = vld [vmem:[%s821_s29 + $0x18] sm:$0xff] }
  0x1e   : > { %v841_v19 = vld [vmem:[%s821_s29 + $0x10] sm:$0xff]  ;;  %v848_v20 = vld [vmem:[%s821_s29 + $0x28] sm:$0xff]  ;;  %v851_v21 = vld [vmem:[%s821_s29 + $0x20] sm:$0xff]  ;;  %p609_p3 = pnand %p608_p2, %p602_p13 }
  0x1f   : > { %v858_v22 = vld [vmem:[%s821_s29 + $0x38] sm:$0xff]  ;;  %v861_v23 = vld [vmem:[%s821_s29 + $0x30] sm:$0xff]  ;;  %v868_v24 = vld [vmem:[%s821_s29 + $0x48] sm:$0xff] }
  0x20   : > { %333 = vrot.lane.b32.xlu1 %v761_v4, %s661_s26  ;;  %331 = vrot.lane.b32.xlu0 %v764_v5, %s661_s26  ;;  %v871_v25 = vld [vmem:[%s821_s29 + $0x40] sm:$0xff]  ;;  %v878_v26 = vld [vmem:[%s821_s29 + $0x58] sm:$0xff] }
  0x21   : > { %v881_v27 = vld [vmem:[%s821_s29 + $0x50] sm:$0xff]  ;;  %v888_v28 = vld [vmem:[%s821_s29 + $0x68] sm:$0xff]  ;;  %v891_v29 = vld [vmem:[%s821_s29 + $0x60] sm:$0xff] }
  0x22   : > { %v898_v30 = vld [vmem:[%s821_s29 + $0x78] sm:$0xff]  ;;  %v901_v31 = vld [vmem:[%s821_s29 + $0x70] sm:$0xff] }
  0x24   : > { %337 = vrot.lane.b32.xlu1 %v771_v6, %s661_s26  ;;  %335 = vrot.lane.b32.xlu0 %v774_v7, %s661_s26 }
  0x28   : > { %341 = vrot.lane.b32.xlu1 %v781_v8, %s661_s26  ;;  %339 = vrot.lane.b32.xlu0 %v784_v9, %s661_s26 }
  0x2c   : > { %345 = vrot.lane.b32.xlu1 %v791_v10, %s661_s26  ;;  %343 = vrot.lane.b32.xlu0 %v794_v11, %s661_s26 }
  0x30   : > { %349 = vrot.lane.b32.xlu1 %v801_v12, %s661_s26  ;;  %347 = vrot.lane.b32.xlu0 %v804_v13, %s661_s26 }
  0x34   : > { %353 = vrot.lane.b32.xlu1 %v811_v14, %s661_s26  ;;  %351 = vrot.lane.b32.xlu0 %v814_v15, %s661_s26 }
  0x38   : > { %196 = vrot.lane.b32.xlu1 %v828_v16, %s661_s26  ;;  %194 = vrot.lane.b32.xlu0 %v831_v17, %s661_s26 }
  0x3c   : > { %200 = vrot.lane.b32.xlu1 %v838_v18, %s661_s26  ;;  %198 = vrot.lane.b32.xlu0 %v841_v19, %s661_s26 }
  0x40   : > { %204 = vrot.lane.b32.xlu1 %v848_v20, %s661_s26  ;;  %202 = vrot.lane.b32.xlu0 %v851_v21, %s661_s26 }
  0x44   : > { %208 = vrot.lane.b32.xlu1 %v858_v22, %s661_s26  ;;  %206 = vrot.lane.b32.xlu0 %v861_v23, %s661_s26 }
  0x48   : > { %212 = vrot.lane.b32.xlu1 %v868_v24, %s661_s26  ;;  %210 = vrot.lane.b32.xlu0 %v871_v25, %s661_s26 }
  0x4c   : > { %216 = vrot.lane.b32.xlu1 %v878_v26, %s661_s26  ;;  %214 = vrot.lane.b32.xlu0 %v881_v27, %s661_s26 }
  0x50   : > { %220 = vrot.lane.b32.xlu1 %v888_v28, %s661_s26  ;;  %218 = vrot.lane.b32.xlu0 %v891_v29, %s661_s26 }
  0x54   : > { %224 = vrot.lane.b32.xlu1 %v898_v30, %s661_s26  ;;  %222 = vrot.lane.b32.xlu0 %v901_v31, %s661_s26 }
  0x8a   : > { %v328_v32 = vpop.permute.xlu1 %327  ;;  %v324_v33 = vpop.permute.xlu0 %323 }
  0x8b   : > { %v373_v34 = vmax.f32 %v741_v0, %v328_v32  ;;  %v371_v35 = vmax.f32 %v744_v1, %v324_v33 }
  0x8d   : > { %v390_v40 = vsel %vm258_vm0, %v373_v34, -inf  ;;  %v387_v41 = vsel %vm258_vm0, %v371_v35, -inf }
  0x8e   : > { %v330_v36 = vpop.permute.xlu1 %329  ;;  %v326_v37 = vpop.permute.xlu0 %325 }
  0x8f   : > { %v374_v38 = vmax.f32 %v751_v2, %v330_v36  ;;  %v372_v39 = vmax.f32 %v754_v3, %v326_v37 }
  0x91   : > { %v391_v42 = vsel %vm258_vm0, %v374_v38, -inf  ;;  %v388_v43 = vsel %vm258_vm0, %v372_v39, -inf }
  0x92   : > { %v392_v44 = vmax.f32 %v390_v40, %v391_v42  ;;  %v389_v45 = vmax.f32 %v387_v41, %v388_v43  ;;  %v334_v46 = vpop.permute.xlu1 %333  ;;  %v332_v47 = vpop.permute.xlu0 %331 }
  0x93   : > { %v376_v48 = vmax.f32 %v761_v4, %v334_v46  ;;  %v375_v49 = vmax.f32 %v764_v5, %v332_v47 }
  0x94   : > { %421 = vrot.lane.b32.xlu1 %v392_v44, %s662_s30  ;;  %419 = vrot.lane.b32.xlu0 %v389_v45, %s662_s30 }
  0x95   : > { %v394_v50 = vsel %vm258_vm0, %v376_v48, -inf  ;;  %v393_v51 = vsel %vm258_vm0, %v375_v49, -inf }
  0x96   : > { %v395_v52 = vmax.f32 %v393_v51, %v394_v50  ;;  %v338_v53 = vpop.permute.xlu1 %337  ;;  %v336_v54 = vpop.permute.xlu0 %335 }
  0x97   : > { %v378_v55 = vmax.f32 %v771_v6, %v338_v53  ;;  %v377_v56 = vmax.f32 %v774_v7, %v336_v54 }
  0x98   : > { %423 = vrot.lane.b32.xlu0 %v395_v52, %s662_s30 }
  0x99   : > { %v397_v57 = vsel %vm258_vm0, %v378_v55, -inf  ;;  %v396_v58 = vsel %vm258_vm0, %v377_v56, -inf }
  0x9a   : > { %v398_v59 = vmax.f32 %v396_v58, %v397_v57  ;;  %v342_v60 = vpop.permute.xlu1 %341  ;;  %v340_v61 = vpop.permute.xlu0 %339 }
  0x9b   : > { %v380_v62 = vmax.f32 %v781_v8, %v342_v60  ;;  %v379_v63 = vmax.f32 %v784_v9, %v340_v61 }
  0x9c   : > { %425 = vrot.lane.b32.xlu1 %v398_v59, %s662_s30 }
  0x9d   : > { %v400_v0 = vsel %vm258_vm0, %v380_v62, -inf  ;;  %v399_v1 = vsel %vm258_vm0, %v379_v63, -inf }
  0x9e   : > { %v401_v2 = vmax.f32 %v399_v1, %v400_v0  ;;  %v346_v3 = vpop.permute.xlu1 %345  ;;  %v344_v4 = vpop.permute.xlu0 %343 }
  0x9f   : > { %v382_v5 = vmax.f32 %v791_v10, %v346_v3  ;;  %v381_v6 = vmax.f32 %v794_v11, %v344_v4 }
  0xa0   : > { %427 = vrot.lane.b32.xlu0 %v401_v2, %s662_s30 }
  0xa1   : > { %v403_v7 = vsel %vm258_vm0, %v382_v5, -inf  ;;  %v402_v8 = vsel %vm258_vm0, %v381_v6, -inf }
  0xa2   : > { %v404_v9 = vmax.f32 %v402_v8, %v403_v7  ;;  %v350_v32 = vpop.permute.xlu1 %349  ;;  %v348_v33 = vpop.permute.xlu0 %347 }
  0xa3   : > { %v384_v34 = vmax.f32 %v801_v12, %v350_v32  ;;  %v383_v35 = vmax.f32 %v804_v13, %v348_v33 }
  0xa4   : > { %429 = vrot.lane.b32.xlu1 %v404_v9, %s662_s30 }
  0xa5   : > { %v406_v10 = vsel %vm258_vm0, %v384_v34, -inf  ;;  %v405_v11 = vsel %vm258_vm0, %v383_v35, -inf }
  0xa6   : > { %v407_v36 = vmax.f32 %v405_v11, %v406_v10  ;;  %v354_v37 = vpop.permute.xlu1 %353  ;;  %v352_v38 = vpop.permute.xlu0 %351 }
  0xa7   : > { %v386_v39 = vmax.f32 %v811_v14, %v354_v37  ;;  %v385_v40 = vmax.f32 %v814_v15, %v352_v38 }
  0xa8   : > { %431 = vrot.lane.b32.xlu0 %v407_v36, %s662_s30 }
  0xa9   : > { %v409_v12 = vsel %vm258_vm0, %v386_v39, -inf  ;;  %v408_v13 = vsel %vm258_vm0, %v385_v40, -inf }
  0xaa   : > { %v410_v41 = vmax.f32 %v408_v13, %v409_v12  ;;  %v197_v42 = vpop.permute.xlu1 %196  ;;  %v195_v43 = vpop.permute.xlu0 %194 }
  0xab   : > { %v243_v44 = vmax.f32 %v828_v16, %v197_v42  ;;  %v242_v45 = vmax.f32 %v831_v17, %v195_v43 }
  0xac   : > { %433 = vrot.lane.b32.xlu1 %v410_v41, %s662_s30 }
  0xad   : > { %v260_v14 = vsel %vm258_vm0, %v243_v44, -inf  ;;  %v259_v15 = vsel %vm258_vm0, %v242_v45, -inf }
  0xae   : > { %v261_v46 = vmax.f32 %v259_v15, %v260_v14  ;;  %v201_v47 = vpop.permute.xlu1 %200  ;;  %v199_v48 = vpop.permute.xlu0 %198 }
  0xaf   : > { %v245_v49 = vmax.f32 %v838_v18, %v201_v47  ;;  %v244_v50 = vmax.f32 %v841_v19, %v199_v48 }
  0xb0   : > { %283 = vst.msk [vmem:[%s956_s5] sm:$0xff] %vm258_vm0, %v261_v46 }
  0xb1   : > { %v263_v16 = vsel %vm258_vm0, %v245_v49, -inf  ;;  %v262_v17 = vsel %vm258_vm0, %v244_v50, -inf }
  0xb2   : > { %v264_v51 = vmax.f32 %v262_v17, %v263_v16  ;;  %v205_v52 = vpop.permute.xlu1 %204  ;;  %v203_v53 = vpop.permute.xlu0 %202 }
  0xb3   : > { %v247_v54 = vmax.f32 %v848_v20, %v205_v52  ;;  %v246_v18 = vmax.f32 %v851_v21, %v203_v53 }
  0xb4   : > { %284 = vst.msk [vmem:[%s956_s5 + $0x8] sm:$0xff] %vm258_vm0, %v264_v51 }
  0xb5   : > { %v266_v19 = vsel %vm258_vm0, %v247_v54, -inf  ;;  %v265_v55 = vsel %vm258_vm0, %v246_v18, -inf }
  0xb6   : > { %v267_v56 = vmax.f32 %v265_v55, %v266_v19  ;;  %v209_v57 = vpop.permute.xlu1 %208  ;;  %v207_v58 = vpop.permute.xlu0 %206 }
  0xb7   : > { %v249_v59 = vmax.f32 %v858_v22, %v209_v57  ;;  %v248_v60 = vmax.f32 %v861_v23, %v207_v58 }
  0xb8   : > { %285 = vst.msk [vmem:[%s956_s5 + $0x10] sm:$0xff] %vm258_vm0, %v267_v56 }
  0xb9   : > { %v269_v20 = vsel %vm258_vm0, %v249_v59, -inf  ;;  %v268_v21 = vsel %vm258_vm0, %v248_v60, -inf }
  0xba   : > { %v270_v61 = vmax.f32 %v268_v21, %v269_v20  ;;  %v213_v62 = vpop.permute.xlu1 %212  ;;  %v211_v63 = vpop.permute.xlu0 %210 }
  0xbb   : > { %v251_v0 = vmax.f32 %v868_v24, %v213_v62  ;;  %v250_v1 = vmax.f32 %v871_v25, %v211_v63 }
  0xbc   : > { %286 = vst.msk [vmem:[%s956_s5 + $0x18] sm:$0xff] %vm258_vm0, %v270_v61 }
  0xbd   : > { %v272_v22 = vsel %vm258_vm0, %v251_v0, -inf  ;;  %v271_v23 = vsel %vm258_vm0, %v250_v1, -inf }
  0xbe   : > { %v273_v2 = vmax.f32 %v271_v23, %v272_v22  ;;  %v217_v3 = vpop.permute.xlu1 %216  ;;  %v215_v4 = vpop.permute.xlu0 %214 }
  0xbf   : > { %v253_v5 = vmax.f32 %v878_v26, %v217_v3  ;;  %v252_v6 = vmax.f32 %v881_v27, %v215_v4 }
  0xc0   : > { %287 = vst.msk [vmem:[%s956_s5 + $0x20] sm:$0xff] %vm258_vm0, %v273_v2 }
  0xc1   : > { %v275_v24 = vsel %vm258_vm0, %v253_v5, -inf  ;;  %v274_v25 = vsel %vm258_vm0, %v252_v6, -inf }
  0xc2   : > { %v276_v7 = vmax.f32 %v274_v25, %v275_v24  ;;  %v221_v8 = vpop.permute.xlu1 %220  ;;  %v219_v9 = vpop.permute.xlu0 %218 }
  0xc3   : > { %v255_v32 = vmax.f32 %v888_v28, %v221_v8  ;;  %v254_v33 = vmax.f32 %v891_v29, %v219_v9 }
  0xc4   : > { %288 = vst.msk [vmem:[%s956_s5 + $0x28] sm:$0xff] %vm258_vm0, %v276_v7 }
  0xc5   : > { %v278_v26 = vsel %vm258_vm0, %v255_v32, -inf  ;;  %v277_v27 = vsel %vm258_vm0, %v254_v33, -inf }
  0xc6   : > { %v279_v34 = vmax.f32 %v277_v27, %v278_v26  ;;  %v225_v35 = vpop.permute.xlu1 %224  ;;  %v223_v10 = vpop.permute.xlu0 %222 }
  0xc7   : > { %v257_v11 = vmax.f32 %v898_v30, %v225_v35  ;;  %v256_v36 = vmax.f32 %v901_v31, %v223_v10 }
  0xc8   : > { %289 = vst.msk [vmem:[%s956_s5 + $0x30] sm:$0xff] %vm258_vm0, %v279_v34 }
  0xc9   : > { %v281_v28 = vsel %vm258_vm0, %v257_v11, -inf  ;;  %v280_v29 = vsel %vm258_vm0, %v256_v36, -inf }
  0xca   : > { %v282_v37 = vmax.f32 %v280_v29, %v281_v28 }
  0xcc   : > { %290 = vst.msk [vmem:[%s956_s5 + $0x38] sm:$0xff] %vm258_vm0, %v282_v37 }
 0x106   : > { %v422_v38 = vpop.permute.xlu1 %421  ;;  %v420_v39 = vpop.permute.xlu0 %419 }
 0x107   : > { %445 = vst.msk [vmem:[%s956_s5 + $0x8] sm:$0xff] %vm443_vm1, %v422_v38  ;;  %444 = vst.msk [vmem:[%s956_s5] sm:$0xff] %vm443_vm1, %v420_v39 }
 0x10a   : > { %v424_v30 = vpop.permute.xlu0 %423 }
 0x10b   : > { %446 = vst.msk [vmem:[%s956_s5 + $0x10] sm:$0xff] %vm443_vm1, %v424_v30 }
 0x10e   : > { %v426_v31 = vpop.permute.xlu1 %425 }
 0x10f   : > { %447 = vst.msk [vmem:[%s956_s5 + $0x18] sm:$0xff] %vm443_vm1, %v426_v31 }
 0x112   : > { %v428_v40 = vpop.permute.xlu0 %427 }
 0x113   : > { %448 = vst.msk [vmem:[%s956_s5 + $0x20] sm:$0xff] %vm443_vm1, %v428_v40 }
 0x116   : > { %v430_v12 = vpop.permute.xlu1 %429 }
 0x117   : > { %449 = vst.msk [vmem:[%s956_s5 + $0x28] sm:$0xff] %vm443_vm1, %v430_v12 }
 0x11a   : > { %v432_v13 = vpop.permute.xlu0 %431 }
 0x11b   : > { %450 = vst.msk [vmem:[%s956_s5 + $0x30] sm:$0xff] %vm443_vm1, %v432_v13 }
 0x11e   : > { %v434_v41 = vpop.permute.xlu1 %433 }
 0x11f   : > { %451 = vst.msk [vmem:[%s956_s5 + $0x38] sm:$0xff] %vm443_vm1, %v434_v41 }
 0x120   : > { %612 = shalt.err (!%p609_p3)
}
 0x121   : > { %s613_s24 = scalar_lea.hbm %s1019_s16, 1024  ;;  %s617_s27 = scalar_lea.hbm %s1070_s2, 2048 }
 0x122   : > { %p614_p4 = scmp.ne.s32.totalorder %s1019_s16, %s613_s24  ;;  %p618_p9 = scmp.lt.s32.totalorder %s1019_s16, %s1070_s2 }
 0x123   : > { %p619_p10 = scmp.lt.s32.totalorder %s617_s27, %s613_s24 }
 0x124   : > { %p615_p7 = pnand %p614_p4, %p718_p5 }
 0x125   : > { %p620_p11 = por %p619_p10, %p618_p9 }
 0x126   : > { %p616_p8 = pneg %p615_p7 }
 0x128   : > { %p621_p12 = pnand %p620_p11, %p616_p8 }
 0x12a   : > { %624 = shalt.err (!%p621_p12)
}
 0x12b   : > { %s664_s3 = smov 128  }
 0x12c   : > { %557 = dma.vmem_to_hbm [thread:$0]  (%p718_p5), %s1021_s7, 1024, %s1019_s16, %s1027_s17, %s664_s3, %s664_s3, %s662_s30  }
 0x12d PF: > { %p563_p13 = scmp.ge.s32.totalorder %s659_s12, 2  ;;  %s481_s4 = sand.u32 1, %s647_s9  }
 0x12e   : > { %s482_s5 = scalar_lea.sflag [#allocation3], %s481_s4 }
 0x12f   : > { %p560_p0 = pnand %p563_p13, %p722_p6 }
 0x131   : > { %p561_p1 = pneg %p560_p0 }
 0x133   : > { %642 = dma.done.wait (%p561_p1), %s482_s5, 1024  }
 0x134   : > { %644 = vsyncadd (%p561_p1), %s482_s5, 4294966272  ;;  %p12_p2 = scmp.ge.s32.totalorder %s705_s15, 4   ;;  %s1073_s9 = smov %s651_s10 }
 0x135   : > { %s1074_s10 = smov %s655_s11  ;;  %s1075_s11 = smov %s716_s18 }
 0x136   : > { %s1076_s12 = smov %s705_s15  ;;  %14 = sbr.rel (!%p12_p2) target bundleno = 3 (0x3), region = 66 }
 0x13b   :  { %487 = vsyncpa [#allocation3], 1 }
 0x13c   :  { %489 = vsyncpa [#allocation3 + $0x1], 1 }

</bundles_post_ra>
